<compile_context>
chip_gen: v5e
topology: v5e:2x2
jax: 0.10.0
libtpu: 0.0.40
codegen_flags: <defaults>
</compile_context>

<pallas_src>
import numpy as np
import jax
import jax.numpy as jnp
from jax import lax
from jax.experimental import pallas as pl
from jax.experimental.pallas import tpu as pltpu

# Small, module-consistent hyperparameters.
NUM_CHANNELS = 7
NUM_CLASSES = 10
NC_PAD = 128            # lane-dense padded class dimension
INPUT_SAMPLES = 96      # must be a multiple of 32 so flatten size matches the Linear
BATCH = 2
BN_EPS = 1e-5


def init_params(key):
    """Deterministic synthetic parameters with the exact PyTorch shapes."""
    ks = jax.random.split(key, 17)
    n_feat = 64 * (INPUT_SAMPLES // 32)
    f32 = jnp.float32
    return {
        # firstconv: Conv1d(C->16, k=64, pad=32, bias=False) + BatchNorm1d(16)
        "w1":    0.1 * jax.random.normal(ks[0], (16, NUM_CHANNELS, 64), f32),
        "bn1_g": 1.0 + 0.1 * jax.random.normal(ks[1], (16,), f32),
        "bn1_b": 0.1 * jax.random.normal(ks[2], (16,), f32),
        "bn1_m": 0.1 * jax.random.normal(ks[3], (16,), f32),
        "bn1_v": 0.5 + 0.5 * jnp.abs(jax.random.normal(ks[4], (16,), f32)),
        # depthwiseConv: Conv1d(16->32, k=1, groups=16) + BatchNorm1d(32)
        "wdw":   0.3 * jax.random.normal(ks[5], (32, 1, 1), f32),
        "bn2_g": 1.0 + 0.1 * jax.random.normal(ks[6], (32,), f32),
        "bn2_b": 0.1 * jax.random.normal(ks[7], (32,), f32),
        "bn2_m": 0.1 * jax.random.normal(ks[8], (32,), f32),
        "bn2_v": 0.5 + 0.5 * jnp.abs(jax.random.normal(ks[9], (32,), f32)),
        # separableConv: Conv1d(32->64, k=16, pad=8) + BatchNorm1d(64)
        "w3":    0.1 * jax.random.normal(ks[10], (64, 32, 16), f32),
        "bn3_g": 1.0 + 0.1 * jax.random.normal(ks[11], (64,), f32),
        "bn3_b": 0.1 * jax.random.normal(ks[12], (64,), f32),
        "bn3_m": 0.1 * jax.random.normal(ks[13], (64,), f32),
        "bn3_v": 0.5 + 0.5 * jnp.abs(jax.random.normal(ks[14], (64,), f32)),
        # classifier: Linear(64*(T//32), num_classes)
        "wlin":  0.1 * jax.random.normal(ks[15], (NUM_CLASSES, n_feat), f32),
        "blin":  0.1 * jax.random.normal(ks[16], (NUM_CLASSES,), f32),
    }


def fold_params(p):
    """Fold eval-mode BatchNorm into conv weights and rearrange for the kernel layout."""
    T = INPUT_SAMPLES
    L1 = T + 1
    L2 = L1 // 4
    L3 = L2 + 1
    L4 = L3 // 8
    C = NUM_CHANNELS
    f32, bf16 = jnp.float32, jnp.bfloat16

    def bn_fold(g, b, m, v):
        s = g / jnp.sqrt(v + BN_EPS)
        return s, b - m * s

    s1, bias1 = bn_fold(p["bn1_g"], p["bn1_b"], p["bn1_m"], p["bn1_v"])
    s2, bias2 = bn_fold(p["bn2_g"], p["bn2_b"], p["bn2_m"], p["bn2_v"])
    s3, bias3 = bn_fold(p["bn3_g"], p["bn3_b"], p["bn3_m"], p["bn3_v"])

    # firstconv in im2col layout, BN1 folded: (64*C, 16), row index = k*C + c.
    w1c = jnp.transpose(p["w1"] * s1[:, None, None], (2, 1, 0)).reshape(64 * C, 16)
    # grouped 1x1 conv + BN2 as a dense (16, 32) expansion (out o reads in o // 2).
    dwv = p["wdw"][:, 0, 0] * s2
    wdw = jnp.zeros((16, 32), f32).at[jnp.arange(32) // 2, jnp.arange(32)].set(dwv)
    # Stages 1 and 2 are linear back-to-back (ELU only after BN2) -> fold into one matmul.
    w12 = (w1c @ wdw).astype(bf16)                                            # (64*C, 32)
    b12 = (bias1.reshape(1, 16) @ wdw + bias2.reshape(1, 32)).astype(f32)     # (1, 32)

    # separableConv in im2col layout, BN3 folded: (16*32, 64), row index = k*32 + c.
    w3c = (jnp.transpose(p["w3"] * s3[:, None, None], (2, 1, 0))
           .reshape(16 * 32, 64).astype(bf16))
    b3 = bias3.reshape(1, 64).astype(f32)

    # classifier: PyTorch flatten order is feature = c*L4 + t  ->  wc[t, c, n];
    # classes padded to a lane-dense 128.
    wc = jnp.transpose(p["wlin"].reshape(NUM_CLASSES, 64, L4), (2, 1, 0))     # (L4, 64, NC)
    wc = jnp.pad(wc, ((0, 0), (0, 0), (0, NC_PAD - NUM_CLASSES))).astype(bf16)
    bc = jnp.pad(p["blin"].reshape(1, NUM_CLASSES),
                 ((0, 0), (0, NC_PAD - NUM_CLASSES))).astype(f32)

    return {"w12": w12, "b12": b12, "w3c": w3c, "b3": b3, "wc": wc, "bc": bc}


def eegnet1d_pallas(x_nct, fp):
    """x_nct: (B, num_channels, T) float32, same as the PyTorch module input."""
    B, C, T = x_nct.shape
    assert T % 32 == 0 and C == NUM_CHANNELS
    L1 = T + 1          # firstconv output length
    L2 = L1 // 4        # after AvgPool(4)
    L3 = L2 + 1         # separableConv output length
    L4 = L3 // 8        # after AvgPool(8)
    assert L4 == T // 32
    LPAD = L2 + 16      # per-batch zero-padded length for the 16-tap conv
    NR = B * LPAD - 15  # rows of the fused stage-3 im2col (rows [b*LPAD, b*LPAD+L3) are valid)
    f32, bf16 = jnp.float32, jnp.bfloat16

    # ---- stage-1 im2col in the wrapper: lane-dense (B*L1, 64*C), batch folded into M ----
    x_btc = jnp.transpose(x_nct, (0, 2, 1)).astype(f32)          # (B, T, C)
    xpad = jnp.pad(x_btc, ((0, 0), (32, 32), (0, 0)))            # (B, T+64, C)
    gather = jnp.arange(L1)[:, None] + jnp.arange(64)[None, :]   # (L1, 64)
    xcol = xpad[:, gather, :].reshape(B * L1, 64 * C).astype(bf16)

    # ---- constant pooling matrices (block-diagonal over the fused batch) ----
    p1 = np.zeros((L2, L1), np.float32)
    for i in range(L2):
        p1[i, 4 * i:4 * i + 4] = 0.25
    p1f = jnp.asarray(np.kron(np.eye(B, dtype=np.float32), p1), dtype=bf16)   # (B*L2, B*L1)

    p2f_np = np.zeros((B * L4, NR), np.float32)
    for b in range(B):
        for t in range(L4):
            p2f_np[b * L4 + t, b * LPAD + 8 * t: b * LPAD + 8 * t + 8] = 0.125
    p2f = jnp.asarray(p2f_np, dtype=bf16)                                     # (B*L4, NR)

    def kernel(xcol_ref, w12_ref, b12_ref, p1f_ref, w3c_ref, b3_ref,
               p2f_ref, wc_ref, bc_ref, o_ref, xpad2):
        def elu(v):
            # exp(min(v, 0)) avoids inf intermediates for large positive v.
            return jnp.where(v > 0, v, jnp.exp(jnp.minimum(v, 0.0)) - 1.0)

        # -- firstconv + BN1 + depthwise 1x1 conv + BN2, folded into ONE matmul, then ELU --
        h2 = jnp.dot(xcol_ref[...], w12_ref[...],
                     preferred_element_type=f32) + b12_ref[...]              # (B*L1, 32)
        h2 = elu(h2)
        # AvgPool1d(4) for all batches at once (block-diagonal pooling matmul).
        h2p = jnp.dot(p1f_ref[...], h2.astype(bf16),
                      preferred_element_type=f32)                            # (B*L2, 32)

        # -- separableConv: per-batch zero-padded buffer (only pad rows are zeroed),
        #    one im2col concat over the 16 taps, one (NR,512)@(512,64) matmul --
        for b in range(B):
            base = b * LPAD
            xpad2[base:base + 8, :] = jnp.zeros((8, 32), f32)
            xpad2[base + 8 + L2:base + LPAD, :] = jnp.zeros((8, 32), f32)
            xpad2[base + 8:base + 8 + L2, :] = h2p[b * L2:(b + 1) * L2, :]
        xp = xpad2[...]                                                      # (B*LPAD, 32)
        cols = jnp.concatenate([xp[k:k + NR, :] for k in range(16)],
                               axis=1).astype(bf16)                          # (NR, 512)
        h3 = jnp.dot(cols, w3c_ref[...],
                     preferred_element_type=f32) + b3_ref[...]               # (NR, 64)
        h3 = elu(h3)
        # AvgPool1d(8) for all batches (rows between batch blocks are unused).
        h3p = jnp.dot(p2f_ref[...], h3.astype(bf16),
                      preferred_element_type=f32)                            # (B*L4, 64)

        # -- classifier (classes lane-padded to 128) --
        rows = []
        for b in range(B):
            ob = bc_ref[...]                                                 # (1, 128)
            for t in range(L4):
                ob = ob + jnp.dot(h3p[b * L4 + t:b * L4 + t + 1, :].astype(bf16),
                                  wc_ref[t], preferred_element_type=f32)
            rows.append(ob)
        o_ref[...] = jnp.concatenate(rows, axis=0)                           # (B, 128)

    grid_spec = pltpu.PrefetchScalarGridSpec(
        num_scalar_prefetch=0,
        grid=(1,),
        in_specs=[
            pl.BlockSpec((B * L1, 64 * C), lambda i: (0, 0)),   # xcol (im2col'd input)
            pl.BlockSpec((64 * C, 32), lambda i: (0, 0)),       # w12
            pl.BlockSpec((1, 32), lambda i: (0, 0)),            # b12
            pl.BlockSpec((B * L2, B * L1), lambda i: (0, 0)),   # pool-1 matrix
            pl.BlockSpec((16 * 32, 64), lambda i: (0, 0)),      # w3c
            pl.BlockSpec((1, 64), lambda i: (0, 0)),            # b3
            pl.BlockSpec((B * L4, NR), lambda i: (0, 0)),       # pool-2 matrix
            pl.BlockSpec((L4, 64, NC_PAD), lambda i: (0, 0, 0)),  # classifier weight
            pl.BlockSpec((1, NC_PAD), lambda i: (0, 0)),        # classifier bias
        ],
        out_specs=pl.BlockSpec((B, NC_PAD), lambda i: (0, 0)),
        scratch_shapes=[pltpu.VMEM((B * LPAD, 32), f32)],       # stage-3 padded buffer
    )

    out = pl.pallas_call(
        kernel,
        out_shape=jax.ShapeDtypeStruct((B, NC_PAD), f32),
        grid_spec=grid_spec,
        compiler_params=pltpu.CompilerParams(
            dimension_semantics=("arbitrary",)),
    )(xcol, fp["w12"], fp["b12"], p1f, fp["w3c"], fp["b3"], p2f, fp["wc"], fp["bc"])
    return out[:, :NUM_CLASSES]


def ref_forward(x, p):
    """Pure-JAX mirror of the PyTorch eval-mode forward (NCW layout), HIGHEST precision."""
    hp = lax.Precision.HIGHEST

    def bn(y, g, b, m, v):
        return (y - m[None, :, None]) / jnp.sqrt(v[None, :, None] + BN_EPS) \
               * g[None, :, None] + b[None, :, None]

    dn = ("NCH", "OIH", "NCH")
    y = lax.conv_general_dilated(x, p["w1"], (1,), [(32, 32)],
                                 dimension_numbers=dn, precision=hp)
    y = bn(y, p["bn1_g"], p["bn1_b"], p["bn1_m"], p["bn1_v"])
    y = lax.conv_general_dilated(y, p["wdw"], (1,), [(0, 0)], dimension_numbers=dn,
                                 feature_group_count=16, precision=hp)
    y = bn(y, p["bn2_g"], p["bn2_b"], p["bn2_m"], p["bn2_v"])
    y = jax.nn.elu(y)
    Lp = y.shape[-1] // 4
    y = y[:, :, :4 * Lp].reshape(y.shape[0], y.shape[1], Lp, 4).mean(-1)
    y = lax.conv_general_dilated(y, p["w3"], (1,), [(8, 8)],
                                 dimension_numbers=dn, precision=hp)
    y = bn(y, p["bn3_g"], p["bn3_b"], p["bn3_m"], p["bn3_v"])
    y = jax.nn.elu(y)
    Lp = y.shape[-1] // 8
    y = y[:, :, :8 * Lp].reshape(y.shape[0], y.shape[1], Lp, 8).mean(-1)
    y = y.reshape(y.shape[0], -1)
    return jnp.dot(y, p["wlin"].T, precision=hp) + p["blin"][None, :]


if __name__ == "__main__":
    key = jax.random.PRNGKey(0)
    pkey, xkey = jax.random.split(key)
    params = init_params(pkey)
    folded = fold_params(params)

    x = jax.random.normal(xkey, (BATCH, NUM_CHANNELS, INPUT_SAMPLES), jnp.float32)

    out = jax.block_until_ready(eegnet1d_pallas(x, folded))
    ref = jax.block_until_ready(ref_forward(x, params))

    assert out.shape == (BATCH, NUM_CLASSES)
    # Kernel matmuls use bf16 operands with f32 accumulation (single-pass MXU), so the
    # tolerance is slightly looser than the old fp32-"highest" setting.
    if not np.allclose(np.asarray(out), np.asarray(ref), rtol=1e-2, atol=2.5e-2):
        raise AssertionError(
            "mismatch vs reference, max abs diff = "
            f"{np.max(np.abs(np.asarray(out) - np.asarray(ref)))}")
    print("KERNEL_OK")
</pallas_src>

<mosaic_0001>
module attributes {stable_mosaic.version = 11 : i64} {
  func.func @kernel(%arg0: i32, %arg1: memref<194x448xbf16, #tpu.memory_space<vmem>>, %arg2: memref<448x32xbf16, #tpu.memory_space<vmem>>, %arg3: memref<1x32xf32, #tpu.memory_space<vmem>>, %arg4: memref<48x194xbf16, #tpu.memory_space<vmem>>, %arg5: memref<512x64xbf16, #tpu.memory_space<vmem>>, %arg6: memref<1x64xf32, #tpu.memory_space<vmem>>, %arg7: memref<6x65xbf16, #tpu.memory_space<vmem>>, %arg8: memref<3x64x128xbf16, #tpu.memory_space<vmem>>, %arg9: memref<1x128xf32, #tpu.memory_space<vmem>>, %arg10: memref<2x128xf32, #tpu.memory_space<vmem>>, %arg11: memref<80x32xf32, #tpu.memory_space<vmem>>) attributes {dimension_semantics = [#tpu.dimension_semantics<arbitrary>], iteration_bounds = array<i64: 1>, scalar_prefetch = 0 : i64, scratch_operands = 1 : i64, tpu.core_type = #tpu.core_type<tc>, window_params = [{pipeline_mode = #tpu.pipeline_mode<synchronous>, transform_indices = @transform_0, window_bounds = array<i64: 194, 448>}, {pipeline_mode = #tpu.pipeline_mode<synchronous>, transform_indices = @transform_1, window_bounds = array<i64: 448, 32>}, {pipeline_mode = #tpu.pipeline_mode<synchronous>, transform_indices = @transform_2, window_bounds = array<i64: 1, 32>}, {pipeline_mode = #tpu.pipeline_mode<synchronous>, transform_indices = @transform_3, window_bounds = array<i64: 48, 194>}, {pipeline_mode = #tpu.pipeline_mode<synchronous>, transform_indices = @transform_4, window_bounds = array<i64: 512, 64>}, {pipeline_mode = #tpu.pipeline_mode<synchronous>, transform_indices = @transform_5, window_bounds = array<i64: 1, 64>}, {pipeline_mode = #tpu.pipeline_mode<synchronous>, transform_indices = @transform_6, window_bounds = array<i64: 6, 65>}, {pipeline_mode = #tpu.pipeline_mode<synchronous>, transform_indices = @transform_7, window_bounds = array<i64: 3, 64, 128>}, {pipeline_mode = #tpu.pipeline_mode<synchronous>, transform_indices = @transform_8, window_bounds = array<i64: 1, 128>}, {pipeline_mode = #tpu.pipeline_mode<synchronous>, transform_indices = @transform_9, window_bounds = array<i64: 2, 128>}]} {
    %c0 = arith.constant 0 : index
    %c0_0 = arith.constant 0 : index
    %0 = vector.load %arg1[%c0, %c0_0] : memref<194x448xbf16, #tpu.memory_space<vmem>>, vector<194x448xbf16>
    %c0_1 = arith.constant 0 : index
    %c0_2 = arith.constant 0 : index
    %1 = vector.load %arg2[%c0_1, %c0_2] : memref<448x32xbf16, #tpu.memory_space<vmem>>, vector<448x32xbf16>
    %cst = arith.constant dense<0.000000e+00> : vector<194x32xf32>
    %2 = tpu.matmul %0, %1, %cst {dimension_numbers = #tpu.dot_dimension_numbers<[1], [0], [0], [1], [0, 0, 1, 1], [], []>} : vector<194x448xbf16>, vector<448x32xbf16>, vector<194x32xf32> -> vector<194x32xf32>
    %c0_3 = arith.constant 0 : index
    %c0_4 = arith.constant 0 : index
    %3 = vector.load %arg3[%c0_3, %c0_4] : memref<1x32xf32, #tpu.memory_space<vmem>>, vector<1x32xf32>
    %4 = vector.broadcast %3 : vector<1x32xf32> to vector<194x32xf32>
    %5 = arith.addf %2, %4 : vector<194x32xf32>
    %cst_5 = arith.constant 0.000000e+00 : f32
    %6 = vector.broadcast %cst_5 : f32 to vector<194x32xf32>
    %7 = arith.cmpf ogt, %5, %6 : vector<194x32xf32>
    %cst_6 = arith.constant 0.000000e+00 : f32
    %8 = vector.broadcast %cst_6 : f32 to vector<194x32xf32>
    %9 = arith.minimumf %5, %8 : vector<194x32xf32>
    %10 = math.exp %9 : vector<194x32xf32>
    %cst_7 = arith.constant 1.000000e+00 : f32
    %11 = vector.broadcast %cst_7 : f32 to vector<194x32xf32>
    %12 = arith.subf %10, %11 : vector<194x32xf32>
    %13 = arith.select %7, %5, %12 : vector<194x32xi1>, vector<194x32xf32>
    %c0_8 = arith.constant 0 : index
    %c0_9 = arith.constant 0 : index
    %14 = vector.load %arg4[%c0_8, %c0_9] : memref<48x194xbf16, #tpu.memory_space<vmem>>, vector<48x194xbf16>
    %15 = arith.truncf %13 : vector<194x32xf32> to vector<194x32xbf16>
    %cst_10 = arith.constant dense<0.000000e+00> : vector<48x32xf32>
    %16 = tpu.matmul %14, %15, %cst_10 {dimension_numbers = #tpu.dot_dimension_numbers<[1], [0], [0], [1], [0, 0, 1, 1], [], []>} : vector<48x194xbf16>, vector<194x32xbf16>, vector<48x32xf32> -> vector<48x32xf32>
    %cst_11 = arith.constant 0.000000e+00 : f32
    %17 = vector.broadcast %cst_11 : f32 to vector<8x32xf32>
    %c0_12 = arith.constant 0 : index
    %c0_13 = arith.constant 0 : index
    %18 = vector.load %arg11[%c0_12, %c0_13] : memref<80x32xf32, #tpu.memory_space<vmem>>, vector<8x32xf32>
    tpu.vector_store %arg11[%c0_12, %c0_13], %17 {strides = array<i32>} : memref<80x32xf32, #tpu.memory_space<vmem>>, vector<8x32xf32>,
    %cst_14 = arith.constant 0.000000e+00 : f32
    %19 = vector.broadcast %cst_14 : f32 to vector<8x32xf32>
    %c32 = arith.constant 32 : index
    %c0_15 = arith.constant 0 : index
    %20 = vector.load %arg11[%c32, %c0_15] : memref<80x32xf32, #tpu.memory_space<vmem>>, vector<8x32xf32>
    tpu.vector_store %arg11[%c32, %c0_15], %19 {strides = array<i32>} : memref<80x32xf32, #tpu.memory_space<vmem>>, vector<8x32xf32>,
    %21 = vector.extract_strided_slice %16 {offsets = [0, 0], sizes = [24, 32], strides = [1, 1]} : vector<48x32xf32> to vector<24x32xf32>
    %c8 = arith.constant 8 : index
    %c0_16 = arith.constant 0 : index
    %22 = vector.load %arg11[%c8, %c0_16] : memref<80x32xf32, #tpu.memory_space<vmem>>, vector<24x32xf32>
    tpu.vector_store %arg11[%c8, %c0_16], %21 {strides = array<i32>} : memref<80x32xf32, #tpu.memory_space<vmem>>, vector<24x32xf32>,
    %cst_17 = arith.constant 0.000000e+00 : f32
    %23 = vector.broadcast %cst_17 : f32 to vector<8x32xf32>
    %c40 = arith.constant 40 : index
    %c0_18 = arith.constant 0 : index
    %24 = vector.load %arg11[%c40, %c0_18] : memref<80x32xf32, #tpu.memory_space<vmem>>, vector<8x32xf32>
    tpu.vector_store %arg11[%c40, %c0_18], %23 {strides = array<i32>} : memref<80x32xf32, #tpu.memory_space<vmem>>, vector<8x32xf32>,
    %cst_19 = arith.constant 0.000000e+00 : f32
    %25 = vector.broadcast %cst_19 : f32 to vector<8x32xf32>
    %c72 = arith.constant 72 : index
    %c0_20 = arith.constant 0 : index
    %26 = vector.load %arg11[%c72, %c0_20] : memref<80x32xf32, #tpu.memory_space<vmem>>, vector<8x32xf32>
    tpu.vector_store %arg11[%c72, %c0_20], %25 {strides = array<i32>} : memref<80x32xf32, #tpu.memory_space<vmem>>, vector<8x32xf32>,
    %27 = vector.extract_strided_slice %16 {offsets = [24, 0], sizes = [24, 32], strides = [1, 1]} : vector<48x32xf32> to vector<24x32xf32>
    %c48 = arith.constant 48 : index
    %c0_21 = arith.constant 0 : index
    %28 = vector.load %arg11[%c48, %c0_21] : memref<80x32xf32, #tpu.memory_space<vmem>>, vector<24x32xf32>
    tpu.vector_store %arg11[%c48, %c0_21], %27 {strides = array<i32>} : memref<80x32xf32, #tpu.memory_space<vmem>>, vector<24x32xf32>,
    %c0_22 = arith.constant 0 : index
    %c0_23 = arith.constant 0 : index
    %29 = vector.load %arg11[%c0_22, %c0_23] : memref<80x32xf32, #tpu.memory_space<vmem>>, vector<80x32xf32>
    %30 = vector.extract_strided_slice %29 {offsets = [0, 0], sizes = [65, 32], strides = [1, 1]} : vector<80x32xf32> to vector<65x32xf32>
    %31 = vector.extract_strided_slice %29 {offsets = [1, 0], sizes = [65, 32], strides = [1, 1]} : vector<80x32xf32> to vector<65x32xf32>
    %32 = vector.extract_strided_slice %29 {offsets = [2, 0], sizes = [65, 32], strides = [1, 1]} : vector<80x32xf32> to vector<65x32xf32>
    %33 = vector.extract_strided_slice %29 {offsets = [3, 0], sizes = [65, 32], strides = [1, 1]} : vector<80x32xf32> to vector<65x32xf32>
    %34 = vector.extract_strided_slice %29 {offsets = [4, 0], sizes = [65, 32], strides = [1, 1]} : vector<80x32xf32> to vector<65x32xf32>
    %35 = vector.extract_strided_slice %29 {offsets = [5, 0], sizes = [65, 32], strides = [1, 1]} : vector<80x32xf32> to vector<65x32xf32>
    %36 = vector.extract_strided_slice %29 {offsets = [6, 0], sizes = [65, 32], strides = [1, 1]} : vector<80x32xf32> to vector<65x32xf32>
    %37 = vector.extract_strided_slice %29 {offsets = [7, 0], sizes = [65, 32], strides = [1, 1]} : vector<80x32xf32> to vector<65x32xf32>
    %38 = vector.extract_strided_slice %29 {offsets = [8, 0], sizes = [65, 32], strides = [1, 1]} : vector<80x32xf32> to vector<65x32xf32>
    %39 = vector.extract_strided_slice %29 {offsets = [9, 0], sizes = [65, 32], strides = [1, 1]} : vector<80x32xf32> to vector<65x32xf32>
    %40 = vector.extract_strided_slice %29 {offsets = [10, 0], sizes = [65, 32], strides = [1, 1]} : vector<80x32xf32> to vector<65x32xf32>
    %41 = vector.extract_strided_slice %29 {offsets = [11, 0], sizes = [65, 32], strides = [1, 1]} : vector<80x32xf32> to vector<65x32xf32>
    %42 = vector.extract_strided_slice %29 {offsets = [12, 0], sizes = [65, 32], strides = [1, 1]} : vector<80x32xf32> to vector<65x32xf32>
    %43 = vector.extract_strided_slice %29 {offsets = [13, 0], sizes = [65, 32], strides = [1, 1]} : vector<80x32xf32> to vector<65x32xf32>
    %44 = vector.extract_strided_slice %29 {offsets = [14, 0], sizes = [65, 32], strides = [1, 1]} : vector<80x32xf32> to vector<65x32xf32>
    %45 = vector.extract_strided_slice %29 {offsets = [15, 0], sizes = [65, 32], strides = [1, 1]} : vector<80x32xf32> to vector<65x32xf32>
    %46 = tpu.concatenate %30, %31, %32, %33, %34, %35, %36, %37, %38, %39, %40, %41, %42, %43, %44, %45 in 1 : vector<65x32xf32>, vector<65x32xf32>, vector<65x32xf32>, vector<65x32xf32>, vector<65x32xf32>, vector<65x32xf32>, vector<65x32xf32>, vector<65x32xf32>, vector<65x32xf32>, vector<65x32xf32>, vector<65x32xf32>, vector<65x32xf32>, vector<65x32xf32>, vector<65x32xf32>, vector<65x32xf32>, vector<65x32xf32> -> vector<65x512xf32>
    %47 = arith.truncf %46 : vector<65x512xf32> to vector<65x512xbf16>
    %c0_24 = arith.constant 0 : index
    %c0_25 = arith.constant 0 : index
    %48 = vector.load %arg5[%c0_24, %c0_25] : memref<512x64xbf16, #tpu.memory_space<vmem>>, vector<512x64xbf16>
    %cst_26 = arith.constant dense<0.000000e+00> : vector<65x64xf32>
    %49 = tpu.matmul %47, %48, %cst_26 {dimension_numbers = #tpu.dot_dimension_numbers<[1], [0], [0], [1], [0, 0, 1, 1], [], []>} : vector<65x512xbf16>, vector<512x64xbf16>, vector<65x64xf32> -> vector<65x64xf32>
    %c0_27 = arith.constant 0 : index
    %c0_28 = arith.constant 0 : index
    %50 = vector.load %arg6[%c0_27, %c0_28] : memref<1x64xf32, #tpu.memory_space<vmem>>, vector<1x64xf32>
    %51 = vector.broadcast %50 : vector<1x64xf32> to vector<65x64xf32>
    %52 = arith.addf %49, %51 : vector<65x64xf32>
    %cst_29 = arith.constant 0.000000e+00 : f32
    %53 = vector.broadcast %cst_29 : f32 to vector<65x64xf32>
    %54 = arith.cmpf ogt, %52, %53 : vector<65x64xf32>
    %cst_30 = arith.constant 0.000000e+00 : f32
    %55 = vector.broadcast %cst_30 : f32 to vector<65x64xf32>
    %56 = arith.minimumf %52, %55 : vector<65x64xf32>
    %57 = math.exp %56 : vector<65x64xf32>
    %cst_31 = arith.constant 1.000000e+00 : f32
    %58 = vector.broadcast %cst_31 : f32 to vector<65x64xf32>
    %59 = arith.subf %57, %58 : vector<65x64xf32>
    %60 = arith.select %54, %52, %59 : vector<65x64xi1>, vector<65x64xf32>
    %c0_32 = arith.constant 0 : index
    %c0_33 = arith.constant 0 : index
    %61 = vector.load %arg7[%c0_32, %c0_33] : memref<6x65xbf16, #tpu.memory_space<vmem>>, vector<6x65xbf16>
    %62 = arith.truncf %60 : vector<65x64xf32> to vector<65x64xbf16>
    %cst_34 = arith.constant dense<0.000000e+00> : vector<6x64xf32>
    %63 = tpu.matmul %61, %62, %cst_34 {dimension_numbers = #tpu.dot_dimension_numbers<[1], [0], [0], [1], [0, 0, 1, 1], [], []>} : vector<6x65xbf16>, vector<65x64xbf16>, vector<6x64xf32> -> vector<6x64xf32>
    %c0_35 = arith.constant 0 : index
    %c0_36 = arith.constant 0 : index
    %64 = vector.load %arg9[%c0_35, %c0_36] : memref<1x128xf32, #tpu.memory_space<vmem>>, vector<1x128xf32>
    %65 = vector.extract_strided_slice %63 {offsets = [0, 0], sizes = [1, 64], strides = [1, 1]} : vector<6x64xf32> to vector<1x64xf32>
    %66 = arith.truncf %65 : vector<1x64xf32> to vector<1x64xbf16>
    %c0_37 = arith.constant 0 : index
    %c0_38 = arith.constant 0 : index
    %c0_39 = arith.constant 0 : index
    %67 = vector.load %arg8[%c0_37, %c0_38, %c0_39] : memref<3x64x128xbf16, #tpu.memory_space<vmem>>, vector<1x64x128xbf16>
    %68 = vector.shape_cast %67 : vector<1x64x128xbf16> to vector<64x128xbf16>
    %cst_40 = arith.constant dense<0.000000e+00> : vector<1x128xf32>
    %69 = tpu.matmul %66, %68, %cst_40 {dimension_numbers = #tpu.dot_dimension_numbers<[1], [0], [0], [1], [0, 0, 1, 1], [], []>} : vector<1x64xbf16>, vector<64x128xbf16>, vector<1x128xf32> -> vector<1x128xf32>
    %70 = arith.addf %64, %69 : vector<1x128xf32>
    %71 = vector.extract_strided_slice %63 {offsets = [1, 0], sizes = [1, 64], strides = [1, 1]} : vector<6x64xf32> to vector<1x64xf32>
    %72 = arith.truncf %71 : vector<1x64xf32> to vector<1x64xbf16>
    %c1 = arith.constant 1 : index
    %c0_41 = arith.constant 0 : index
    %c0_42 = arith.constant 0 : index
    %73 = vector.load %arg8[%c1, %c0_41, %c0_42] : memref<3x64x128xbf16, #tpu.memory_space<vmem>>, vector<1x64x128xbf16>
    %74 = vector.shape_cast %73 : vector<1x64x128xbf16> to vector<64x128xbf16>
    %cst_43 = arith.constant dense<0.000000e+00> : vector<1x128xf32>
    %75 = tpu.matmul %72, %74, %cst_43 {dimension_numbers = #tpu.dot_dimension_numbers<[1], [0], [0], [1], [0, 0, 1, 1], [], []>} : vector<1x64xbf16>, vector<64x128xbf16>, vector<1x128xf32> -> vector<1x128xf32>
    %76 = arith.addf %70, %75 : vector<1x128xf32>
    %77 = vector.extract_strided_slice %63 {offsets = [2, 0], sizes = [1, 64], strides = [1, 1]} : vector<6x64xf32> to vector<1x64xf32>
    %78 = arith.truncf %77 : vector<1x64xf32> to vector<1x64xbf16>
    %c2 = arith.constant 2 : index
    %c0_44 = arith.constant 0 : index
    %c0_45 = arith.constant 0 : index
    %79 = vector.load %arg8[%c2, %c0_44, %c0_45] : memref<3x64x128xbf16, #tpu.memory_space<vmem>>, vector<1x64x128xbf16>
    %80 = vector.shape_cast %79 : vector<1x64x128xbf16> to vector<64x128xbf16>
    %cst_46 = arith.constant dense<0.000000e+00> : vector<1x128xf32>
    %81 = tpu.matmul %78, %80, %cst_46 {dimension_numbers = #tpu.dot_dimension_numbers<[1], [0], [0], [1], [0, 0, 1, 1], [], []>} : vector<1x64xbf16>, vector<64x128xbf16>, vector<1x128xf32> -> vector<1x128xf32>
    %82 = arith.addf %76, %81 : vector<1x128xf32>
    %c0_47 = arith.constant 0 : index
    %c0_48 = arith.constant 0 : index
    %83 = vector.load %arg9[%c0_47, %c0_48] : memref<1x128xf32, #tpu.memory_space<vmem>>, vector<1x128xf32>
    %84 = vector.extract_strided_slice %63 {offsets = [3, 0], sizes = [1, 64], strides = [1, 1]} : vector<6x64xf32> to vector<1x64xf32>
    %85 = arith.truncf %84 : vector<1x64xf32> to vector<1x64xbf16>
    %c0_49 = arith.constant 0 : index
    %c0_50 = arith.constant 0 : index
    %c0_51 = arith.constant 0 : index
    %86 = vector.load %arg8[%c0_49, %c0_50, %c0_51] : memref<3x64x128xbf16, #tpu.memory_space<vmem>>, vector<1x64x128xbf16>
    %87 = vector.shape_cast %86 : vector<1x64x128xbf16> to vector<64x128xbf16>
    %cst_52 = arith.constant dense<0.000000e+00> : vector<1x128xf32>
    %88 = tpu.matmul %85, %87, %cst_52 {dimension_numbers = #tpu.dot_dimension_numbers<[1], [0], [0], [1], [0, 0, 1, 1], [], []>} : vector<1x64xbf16>, vector<64x128xbf16>, vector<1x128xf32> -> vector<1x128xf32>
    %89 = arith.addf %83, %88 : vector<1x128xf32>
    %90 = vector.extract_strided_slice %63 {offsets = [4, 0], sizes = [1, 64], strides = [1, 1]} : vector<6x64xf32> to vector<1x64xf32>
    %91 = arith.truncf %90 : vector<1x64xf32> to vector<1x64xbf16>
    %c1_53 = arith.constant 1 : index
    %c0_54 = arith.constant 0 : index
    %c0_55 = arith.constant 0 : index
    %92 = vector.load %arg8[%c1_53, %c0_54, %c0_55] : memref<3x64x128xbf16, #tpu.memory_space<vmem>>, vector<1x64x128xbf16>
    %93 = vector.shape_cast %92 : vector<1x64x128xbf16> to vector<64x128xbf16>
    %cst_56 = arith.constant dense<0.000000e+00> : vector<1x128xf32>
    %94 = tpu.matmul %91, %93, %cst_56 {dimension_numbers = #tpu.dot_dimension_numbers<[1], [0], [0], [1], [0, 0, 1, 1], [], []>} : vector<1x64xbf16>, vector<64x128xbf16>, vector<1x128xf32> -> vector<1x128xf32>
    %95 = arith.addf %89, %94 : vector<1x128xf32>
    %96 = vector.extract_strided_slice %63 {offsets = [5, 0], sizes = [1, 64], strides = [1, 1]} : vector<6x64xf32> to vector<1x64xf32>
    %97 = arith.truncf %96 : vector<1x64xf32> to vector<1x64xbf16>
    %c2_57 = arith.constant 2 : index
    %c0_58 = arith.constant 0 : index
    %c0_59 = arith.constant 0 : index
    %98 = vector.load %arg8[%c2_57, %c0_58, %c0_59] : memref<3x64x128xbf16, #tpu.memory_space<vmem>>, vector<1x64x128xbf16>
    %99 = vector.shape_cast %98 : vector<1x64x128xbf16> to vector<64x128xbf16>
    %cst_60 = arith.constant dense<0.000000e+00> : vector<1x128xf32>
    %100 = tpu.matmul %97, %99, %cst_60 {dimension_numbers = #tpu.dot_dimension_numbers<[1], [0], [0], [1], [0, 0, 1, 1], [], []>} : vector<1x64xbf16>, vector<64x128xbf16>, vector<1x128xf32> -> vector<1x128xf32>
    %101 = arith.addf %95, %100 : vector<1x128xf32>
    %102 = tpu.concatenate %82, %101 in 0 : vector<1x128xf32>, vector<1x128xf32> -> vector<2x128xf32>
    %c0_61 = arith.constant 0 : index
    %c0_62 = arith.constant 0 : index
    %103 = vector.load %arg10[%c0_61, %c0_62] : memref<2x128xf32, #tpu.memory_space<vmem>>, vector<2x128xf32>
    tpu.vector_store %arg10[%c0_61, %c0_62], %102 {strides = array<i32>} : memref<2x128xf32, #tpu.memory_space<vmem>>, vector<2x128xf32>,
    return
  }
  func.func @transform_0(%arg0: i32) -> (i32, i32) {
    %c0_i32 = arith.constant 0 : i32
    %c0_i32_0 = arith.constant 0 : i32
    %c0_i32_1 = arith.constant 0 : i32
    return %c0_i32, %c0_i32_0 : i32, i32
  }
  func.func @transform_1(%arg0: i32) -> (i32, i32) {
    %c0_i32 = arith.constant 0 : i32
    %c0_i32_0 = arith.constant 0 : i32
    %c0_i32_1 = arith.constant 0 : i32
    return %c0_i32, %c0_i32_0 : i32, i32
  }
  func.func @transform_2(%arg0: i32) -> (i32, i32) {
    %c0_i32 = arith.constant 0 : i32
    %c0_i32_0 = arith.constant 0 : i32
    %c0_i32_1 = arith.constant 0 : i32
    return %c0_i32, %c0_i32_0 : i32, i32
  }
  func.func @transform_3(%arg0: i32) -> (i32, i32) {
    %c0_i32 = arith.constant 0 : i32
    %c0_i32_0 = arith.constant 0 : i32
    %c0_i32_1 = arith.constant 0 : i32
    return %c0_i32, %c0_i32_0 : i32, i32
  }
  func.func @transform_4(%arg0: i32) -> (i32, i32) {
    %c0_i32 = arith.constant 0 : i32
    %c0_i32_0 = arith.constant 0 : i32
    %c0_i32_1 = arith.constant 0 : i32
    return %c0_i32, %c0_i32_0 : i32, i32
  }
  func.func @transform_5(%arg0: i32) -> (i32, i32) {
    %c0_i32 = arith.constant 0 : i32
    %c0_i32_0 = arith.constant 0 : i32
    %c0_i32_1 = arith.constant 0 : i32
    return %c0_i32, %c0_i32_0 : i32, i32
  }
  func.func @transform_6(%arg0: i32) -> (i32, i32) {
    %c0_i32 = arith.constant 0 : i32
    %c0_i32_0 = arith.constant 0 : i32
    %c0_i32_1 = arith.constant 0 : i32
    return %c0_i32, %c0_i32_0 : i32, i32
  }
  func.func @transform_7(%arg0: i32) -> (i32, i32, i32) {
    %c0_i32 = arith.constant 0 : i32
    %c0_i32_0 = arith.constant 0 : i32
    %c0_i32_1 = arith.constant 0 : i32
    %c0_i32_2 = arith.constant 0 : i32
    return %c0_i32, %c0_i32_0, %c0_i32_1 : i32, i32, i32
  }
  func.func @transform_8(%arg0: i32) -> (i32, i32) {
    %c0_i32 = arith.constant 0 : i32
    %c0_i32_0 = arith.constant 0 : i32
    %c0_i32_1 = arith.constant 0 : i32
    return %c0_i32, %c0_i32_0 : i32, i32
  }
  func.func @transform_9(%arg0: i32) -> (i32, i32) {
    %c0_i32 = arith.constant 0 : i32
    %c0_i32_0 = arith.constant 0 : i32
    %c0_i32_1 = arith.constant 0 : i32
    return %c0_i32, %c0_i32_0 : i32, i32
  }
}

</mosaic_0001>

<bundles_post_ra>
// kernel: tpu_custom_call.1
= control target key start
LH: loop header
LB: loop body
LE: loop exit
PB: predicated region body
PF: predicated region fallthrough
CT: control target
= control target key end

     0   :  { %14 = vsyncpa [#allocation4], 0  ;;  %s4615_s0 = inlined_call_operand.vmem [shape: bf16[194,448], index: 0, kind: input, shape index: {}]   ;;  %s4616_s1 = inlined_call_operand.vmem [shape: bf16[448,32], index: 1, kind: input, shape index: {}]   ;;  %s4617_s2 = inlined_call_operand.hbm [shape: f32[1,32], index: 2, kind: input, shape index: {}]   ;;  %s4618_s3 = inlined_call_operand.vmem [shape: bf16[48,194], index: 3, kind: input, shape index: {}]   ;;  %s4619_s4 = inlined_call_operand.vmem [shape: bf16[512,64], index: 4, kind: input, shape index: {}]   ;;  %s4620_s5 = inlined_call_operand.hbm [shape: f32[1,64], index: 5, kind: input, shape index: {}]   ;;  %s4621_s6 = inlined_call_operand.hbm [shape: bf16[6,65], index: 6, kind: input, shape index: {}]   ;;  %s4622_s7 = inlined_call_operand.vmem [shape: bf16[3,64,128], index: 7, kind: input, shape index: {}]   ;;  %s4623_s8 = inlined_call_operand.vmem [shape: f32[1,128], index: 8, kind: input, shape index: {}]   ;;  %s4624_s9 = inlined_call_operand.hbm [shape: f32[2,128], index: 9, kind: output, shape index: {}]  }
   0x1   :  { %15 = vsyncpa [#allocation7], 0  ;;  %s41_s11 = sshll.u32 %s4620_s5, 4  ;;  %s42_s11 = int_to_ptr.hbm [resolvable:$true] %s41_s11 }
   0x2   :  { %16 = vsyncpa [#allocation5], 0  ;;  %s3395_s12 = smov [#allocation6]   ;;  %s26_s16 = sshll.u32 %s4617_s2, 4  ;;  %s27_s16 = int_to_ptr.hbm [resolvable:$true] %s26_s16 }
   0x3   :  { %s43_s13 = sshll.u32 %s3395_s12, 4  ;;  %s3396_s17 = smov [#allocation3]   ;;  %s44_s13 = int_to_ptr.vmem [resolvable:$true] %s43_s13 }
   0x4   :  { %46 = dma.hbm_to_vmem [thread:$0]  %s42_s11, 16, %s44_s13, [#allocation7]  }
   0x5   :  { %s28_s18 = sshll.u32 %s3396_s17, 4  ;;  %s52_s21 = sshll.u32 %s4621_s6, 4  ;;  %s29_s18 = int_to_ptr.vmem [resolvable:$true] %s28_s18  ;;  %s53_s21 = int_to_ptr.hbm [resolvable:$true] %s52_s21 }
   0x6   :  { %31 = dma.hbm_to_vmem [thread:$0]  %s27_s16, 16, %s29_s18, [#allocation4]  }
   0x7   :  { %s3397_s5 = smov [#allocation8]  }
   0x8   :  { %s54_s22 = sshll.u32 %s3397_s5, 4  ;;  %s55_s22 = int_to_ptr.vmem [resolvable:$true] %s54_s22 }
   0x9   :  { %57 = dma.hbm_to_vmem [thread:$0]  %s53_s21, 64, %s55_s22, [#allocation7]  }
   0xa   :  { %3389 = dma.done.wait [#allocation4], 16  }
   0xb   :  { %3390 = vsyncadd [#allocation4], 4294967280 }
   0xc   :  { %3391 = dma.done.wait [#allocation7], 80  }
   0xd   :  { %3392 = vsyncadd [#allocation7], 4294967216  ;;  %v2988_v0 = vld [vmem:[%s4616_s1 + $0x38] sm:$0xff]  ;;  %v2987_v3 = vld [vmem:[%s4616_s1 + $0x30] sm:$0xff]  ;;  %vm594_vm0 = vcmask 523264   ;;  %s3400_s25 = smov 32  }
   0xe   :  { %v2996_v1 = vld [vmem:[%s4616_s1 + $0x78] sm:$0xff]  ;;  %634 = vmatpush.bf16.msra.mxu0 %v2988_v0  ;;  %v2995_v4 = vld [vmem:[%s4616_s1 + $0x70] sm:$0xff]  ;;  %v2986_v8 = vld [vmem:[%s4616_s1 + $0x28] sm:$0xff]  ;;  %s3403_s12 = smov [#allocation9]   ;;  %s2345_s15 = sshll.u32 %s4624_s9, 4  ;;  %s2346_s15 = int_to_ptr.hbm [resolvable:$true] %s2345_s15 }
   0xf   :  { %v3004_v2 = vld [vmem:[%s4616_s1 + $0xb8] sm:$0xff]  ;;  %707 = vmatpush.bf16.msra.mxu1 %v2996_v1  ;;  %v3003_v5 = vld [vmem:[%s4616_s1 + $0xb0] sm:$0xff]  ;;  %v2994_v9 = vld [vmem:[%s4616_s1 + $0x68] sm:$0xff]  ;;  %s2343_s13 = sshll.u32 %s3403_s12, 4  ;;  %s2344_s13 = int_to_ptr.vmem [resolvable:$true] %s2343_s13 }
  0x10   :  { %780 = vmatpush.bf16.msra.mxu2 %v3004_v2  ;;  %v3008_v6 = vld [vmem:[%s4616_s1 + $0xd8] sm:$0xff]  ;;  %v3007_v7 = vld [vmem:[%s4616_s1 + $0xd0] sm:$0xff]  ;;  %v3002_v10 = vld [vmem:[%s4616_s1 + $0xa8] sm:$0xff] }
  0x11   :  { %857 = vmatpush.bf16.msra.mxu3 %v3008_v6  ;;  %v3006_v11 = vld [vmem:[%s4616_s1 + $0xc8] sm:$0xff]  ;;  %v2985_v12 = vld [vmem:[%s4616_s1 + $0x20] sm:$0xff]  ;;  %v2368_v17 = vld [vmem:[%s4615_s0 + $0x18] sm:$0xf0] }
  0x12   :  { %635 = vmatpush.bf16.msra.mxu0 %v2987_v3  ;;  %v2993_v13 = vld [vmem:[%s4616_s1 + $0x60] sm:$0xff]  ;;  %v2934_v16 = vld [vmem:[%s4615_s0 + $0xc] sm:$0xf]  ;;  %v2984_v18 = vld [vmem:[%s4616_s1 + $0x18] sm:$0xff] }
  0x13   :  { %708 = vmatpush.bf16.msra.mxu1 %v2995_v4  ;;  %v3001_v14 = vld [vmem:[%s4616_s1 + $0xa0] sm:$0xff]  ;;  %v2992_v19 = vld [vmem:[%s4616_s1 + $0x58] sm:$0xff]  ;;  %v2371_v21 = vor.u32 %v2934_v16, %v2368_v17  ;;  %v2983_v22 = vld [vmem:[%s4616_s1 + $0x10] sm:$0xff] }
  0x14   :  { %781 = vmatpush.bf16.msra.mxu2 %v3003_v5  ;;  %v3005_v15 = vld [vmem:[%s4616_s1 + $0xc0] sm:$0xff]  ;;  %v3000_v20 = vld [vmem:[%s4616_s1 + $0x98] sm:$0xff]  ;;  %v2991_v23 = vld [vmem:[%s4616_s1 + $0x50] sm:$0xff] }
  0x15   :  { %858 = vmatpush.bf16.msra.mxu3 %v3007_v7  ;;  %v2999_v24 = vld [vmem:[%s4616_s1 + $0x90] sm:$0xff]  ;;  %v2982_v25 = vld [vmem:[%s4616_s1 + $0x8] sm:$0xff]  ;;  %v2981_v28 = vld [vmem:[%s4616_s1] sm:$0xff] }
  0x16   :  { %636 = vmatpush.bf16.msra.mxu0 %v2986_v8  ;;  %v2990_v26 = vld [vmem:[%s4616_s1 + $0x48] sm:$0xff]  ;;  %v2989_v29 = vld [vmem:[%s4616_s1 + $0x40] sm:$0xff]  ;;  %v2935_v31 = vld [vmem:[%s4615_s0 + $0xc] sm:$0xf0] }
  0x17   :  { %709 = vmatpush.bf16.msra.mxu1 %v2994_v9  ;;  %v2998_v27 = vld [vmem:[%s4616_s1 + $0x88] sm:$0xff]  ;;  %v2358_v30 = vld [vmem:[%s4615_s0] sm:$0xf]  ;;  %v2933_v32 = vld [vmem:[%s4615_s0 + $0x4] sm:$0xf] }
  0x18   :  { %782 = vmatpush.bf16.msra.mxu2 %v3002_v10  ;;  %v2360_v33 = vld [vmem:[%s4615_s0 + $0x10] sm:$0xf0]  ;;  %v2997_v34 = vld [vmem:[%s4616_s1 + $0x80] sm:$0xff]  ;;  %v2366_v35 = vld [vmem:[%s4615_s0 + $0x8] sm:$0xf]  ;;  %v2359_v37 = vor.u32 %v2935_v31, %v2358_v30  ;;  %s3401_s1 = smov 64  }
  0x19   :  { %859 = vmatpush.bf16.msra.mxu3 %v3006_v11  ;;  %v2936_v36 = vld [vmem:[%s4615_s0 + $0x14] sm:$0xf0]  ;;  %v2363_v38 = vor.u32 %v2933_v32, %v2360_v33  ;;  %v2938_v39 = vld [vmem:[%s4615_s0 + $0x2c] sm:$0xf]  ;;  %v2384_v40 = vld [vmem:[%s4615_s0 + $0x38] sm:$0xf0] }
  0x1a   :  { %637 = vmatpush.bf16.msra.mxu0 %v2985_v12  ;;  %v2367_v41 = vor.u32 %v2936_v36, %v2366_v35  ;;  %v2387_v42 = vor.u32 %v2938_v39, %v2384_v40  ;;  %v2374_v43 = vld [vmem:[%s4615_s0 + $0x20] sm:$0xf]  ;;  %v2939_v44 = vld [vmem:[%s4615_s0 + $0x2c] sm:$0xf0]  ;;  %v2937_v45 = vld [vmem:[%s4615_s0 + $0x24] sm:$0xf] }
  0x1b   :  { %710 = vmatpush.bf16.msra.mxu1 %v2993_v13  ;;  %v2376_v46 = vld [vmem:[%s4615_s0 + $0x30] sm:$0xf0]  ;;  %v2382_v47 = vld [vmem:[%s4615_s0 + $0x28] sm:$0xf]  ;;  %v2940_v48 = vld [vmem:[%s4615_s0 + $0x34] sm:$0xf0]  ;;  %v2375_v49 = vor.u32 %v2939_v44, %v2374_v43 }
  0x1c   :  { %783 = vmatpush.bf16.msra.mxu2 %v3001_v14  ;;  %v2379_v50 = vor.u32 %v2937_v45, %v2376_v46  ;;  %v2942_v51 = vld [vmem:[%s4615_s0 + $0x4c] sm:$0xf]  ;;  %v2400_v52 = vld [vmem:[%s4615_s0 + $0x58] sm:$0xf0]  ;;  %v2383_v53 = vor.u32 %v2940_v48, %v2382_v47  ;;  %v2390_v55 = vld [vmem:[%s4615_s0 + $0x40] sm:$0xf] }
  0x1d   :  { %860 = vmatpush.bf16.msra.mxu3 %v3005_v15  ;;  %v2403_v54 = vor.u32 %v2942_v51, %v2400_v52  ;;  %v2943_v56 = vld [vmem:[%s4615_s0 + $0x4c] sm:$0xf0]  ;;  %v2941_v57 = vld [vmem:[%s4615_s0 + $0x44] sm:$0xf]  ;;  %v2392_v58 = vld [vmem:[%s4615_s0 + $0x50] sm:$0xf0] }
  0x1e   :  { %638 = vmatpush.bf16.msra.mxu0 %v2984_v18  ;;  %v2398_v59 = vld [vmem:[%s4615_s0 + $0x48] sm:$0xf]  ;;  %v2944_v60 = vld [vmem:[%s4615_s0 + $0x54] sm:$0xf0]  ;;  %v2391_v61 = vor.u32 %v2943_v56, %v2390_v55  ;;  %v2395_v62 = vor.u32 %v2941_v57, %v2392_v58  ;;  %v2946_v63 = vld [vmem:[%s4615_s0 + $0x6c] sm:$0xf] }
  0x1f   :  { %711 = vmatpush.bf16.msra.mxu1 %v2992_v19  ;;  %v2416_v0 = vld [vmem:[%s4615_s0 + $0x78] sm:$0xf0]  ;;  %v2399_v1 = vor.u32 %v2944_v60, %v2398_v59  ;;  %v2406_v3 = vld [vmem:[%s4615_s0 + $0x60] sm:$0xf]  ;;  %v2947_v4 = vld [vmem:[%s4615_s0 + $0x6c] sm:$0xf0] }
  0x20   :  { %784 = vmatpush.bf16.msra.mxu2 %v3000_v20  ;;  %2660 = vmatmul.msk.bf16.vlgmr.msra.gmra.mxu3 %vm594_vm0, %v2371_v21  ;;  %v2419_v2 = vor.u32 %v2946_v63, %v2416_v0  ;;  %v2945_v5 = vld [vmem:[%s4615_s0 + $0x64] sm:$0xf]  ;;  %v2408_v6 = vld [vmem:[%s4615_s0 + $0x70] sm:$0xf0]  ;;  %v2414_v7 = vld [vmem:[%s4615_s0 + $0x68] sm:$0xf]  ;;  %v2407_v9 = vor.u32 %v2947_v4, %v2406_v3 }
  0x21   :  { %v2948_v8 = vld [vmem:[%s4615_s0 + $0x74] sm:$0xf0]  ;;  %v2411_v10 = vor.u32 %v2945_v5, %v2408_v6  ;;  %v2950_v11 = vld [vmem:[%s4615_s0 + $0x8c] sm:$0xf]  ;;  %v2432_v12 = vld [vmem:[%s4615_s0 + $0x98] sm:$0xf0] }
  0x22   :  { %639 = vmatpush.bf16.msra.mxu0 %v2983_v22  ;;  %v2415_v13 = vor.u32 %v2948_v8, %v2414_v7  ;;  %v2435_v14 = vor.u32 %v2950_v11, %v2432_v12  ;;  %v2422_v15 = vld [vmem:[%s4615_s0 + $0x80] sm:$0xf]  ;;  %v2951_v16 = vld [vmem:[%s4615_s0 + $0x8c] sm:$0xf0]  ;;  %v2949_v17 = vld [vmem:[%s4615_s0 + $0x84] sm:$0xf] }
  0x23   :  { %712 = vmatpush.bf16.msra.mxu1 %v2991_v23  ;;  %v2424_v18 = vld [vmem:[%s4615_s0 + $0x90] sm:$0xf0]  ;;  %v2430_v19 = vld [vmem:[%s4615_s0 + $0x88] sm:$0xf]  ;;  %v2952_v20 = vld [vmem:[%s4615_s0 + $0x94] sm:$0xf0]  ;;  %v2423_v21 = vor.u32 %v2951_v16, %v2422_v15 }
  0x24   :  { %785 = vmatpush.bf16.msra.mxu2 %v2999_v24  ;;  %v2427_v22 = vor.u32 %v2949_v17, %v2424_v18  ;;  %v2954_v23 = vld [vmem:[%s4615_s0 + $0xac] sm:$0xf]  ;;  %v2448_v24 = vld [vmem:[%s4615_s0 + $0xb8] sm:$0xf0]  ;;  %v2440_v30 = vld [vmem:[%s4615_s0 + $0xb0] sm:$0xf0] }
  0x25   :  { %v2446_v31 = vld [vmem:[%s4615_s0 + $0xa8] sm:$0xf]  ;;  %v2956_v32 = vld [vmem:[%s4615_s0 + $0xb4] sm:$0xf0]  ;;  %v2958_v35 = vld [vmem:[%s4615_s0 + $0xcc] sm:$0xf] }
  0x26   :  { %640 = vmatpush.bf16.msra.mxu0 %v2982_v25  ;;  %v2431_v25 = vor.u32 %v2952_v20, %v2430_v19  ;;  %v2464_v36 = vld [vmem:[%s4615_s0 + $0xd8] sm:$0xf0]  ;;  %v2454_v39 = vld [vmem:[%s4615_s0 + $0xc0] sm:$0xf]  ;;  %v2959_v40 = vld [vmem:[%s4615_s0 + $0xcc] sm:$0xf0] }
  0x27   :  { %713 = vmatpush.bf16.msra.mxu1 %v2990_v26  ;;  %v2451_v26 = vor.u32 %v2954_v23, %v2448_v24  ;;  %v2462_v43 = vld [vmem:[%s4615_s0 + $0xc8] sm:$0xf]  ;;  %v2960_v44 = vld [vmem:[%s4615_s0 + $0xd4] sm:$0xf0]  ;;  %v2455_v45 = vor.u32 %v2959_v40, %v2454_v39  ;;  %v2962_v47 = vld [vmem:[%s4615_s0 + $0xec] sm:$0xf] }
  0x28   :  { %786 = vmatpush.bf16.msra.mxu2 %v2998_v27  ;;  %v2438_v27 = vld [vmem:[%s4615_s0 + $0xa0] sm:$0xf]  ;;  %v2480_v48 = vld [vmem:[%s4615_s0 + $0xf8] sm:$0xf0]  ;;  %v2963_v52 = vld [vmem:[%s4615_s0 + $0xec] sm:$0xf0] }
  0x29   :  { %v2470_v51 = vld [vmem:[%s4615_s0 + $0xe0] sm:$0xf]  ;;  %v2478_v55 = vld [vmem:[%s4615_s0 + $0xe8] sm:$0xf]  ;;  %v2964_v56 = vld [vmem:[%s4615_s0 + $0xf4] sm:$0xf0] }
  0x2a   :  { %641 = vmatpush.bf16.msra.mxu0 %v2981_v28  ;;  %v2955_v28 = vld [vmem:[%s4615_s0 + $0xac] sm:$0xf0]  ;;  %v2471_v57 = vor.u32 %v2963_v52, %v2470_v51  ;;  %v2966_v59 = vld [vmem:[%s4615_s0 + $0x10c] sm:$0xf]  ;;  %v2496_v60 = vld [vmem:[%s4615_s0 + $0x118] sm:$0xf0] }
  0x2b   :  { %714 = vmatpush.bf16.msra.mxu1 %v2989_v29  ;;  %v2953_v29 = vld [vmem:[%s4615_s0 + $0xa4] sm:$0xf]  ;;  %v2439_v33 = vor.u32 %v2955_v28, %v2438_v27  ;;  %v2486_v0 = vld [vmem:[%s4615_s0 + $0x100] sm:$0xf]  ;;  %v2488_v3 = vld [vmem:[%s4615_s0 + $0x110] sm:$0xf0] }
  0x2c   :  { %787 = vmatpush.bf16.msra.mxu2 %v2997_v34  ;;  %v2443_v34 = vor.u32 %v2953_v29, %v2440_v30  ;;  %v3766_v4 = vld [vmem:[#allocation3] ss:$0 sm:$0xff]  ;;  %v2494_v5 = vld [vmem:[%s4615_s0 + $0x108] sm:$0xf]  ;;  %v2968_v6 = vld [vmem:[%s4615_s0 + $0x114] sm:$0xf0] }
  0x2d   :  { %642 = vmatmul.bf16.vlgmr.msra.gmra.mxu0 %v2359_v37  ;;  %v2447_v37 = vor.u32 %v2956_v32, %v2446_v31  ;;  %v2971_v27 = vld [vmem:[%s4615_s0 + $0x12c] sm:$0xf0]  ;;  %v2969_v29 = vld [vmem:[%s4615_s0 + $0x124] sm:$0xf]  ;;  %v2504_v30 = vld [vmem:[%s4615_s0 + $0x130] sm:$0xf0] }
  0x2e   :  { %715 = vmatmul.bf16.vlgmr.msra.gmra.mxu1 %v2363_v38  ;;  %v2467_v38 = vor.u32 %v2958_v35, %v2464_v36  ;;  %v2510_v31 = vld [vmem:[%s4615_s0 + $0x128] sm:$0xf]  ;;  %v2972_v32 = vld [vmem:[%s4615_s0 + $0x134] sm:$0xf0]  ;;  %v2507_v35 = vor.u32 %v2969_v29, %v2504_v30  ;;  %v2974_v36 = vld [vmem:[%s4615_s0 + $0x14c] sm:$0xf] }
  0x2f   :  { %788 = vmatmul.bf16.vlgmr.msra.gmra.mxu2 %v2367_v41  ;;  %v2957_v41 = vld [vmem:[%s4615_s0 + $0xc4] sm:$0xf]  ;;  %v2542_v29 = vld [vmem:[%s4615_s0 + $0x168] sm:$0xf]  ;;  %v2980_v30 = vld [vmem:[%s4615_s0 + $0x174] sm:$0xf0] }
  0x30   :  { %2661 = vmatmul.msk.bf16.gmra.mxu3 %vm594_vm0, %v2387_v42  ;;  %v2456_v42 = vld [vmem:[%s4615_s0 + $0xd0] sm:$0xf0] }
  0x31   :  { %v2459_v46 = vor.u32 %v2957_v41, %v2456_v42  ;;  %v2511_v42 = vor.u32 %v2972_v32, %v2510_v31 }
  0x3d   :  { %647 = vmatmul.bf16.gmra.mxu0 %v2375_v49  ;;  %v2463_v49 = vor.u32 %v2960_v44, %v2462_v43 }
  0x3e   :  { %720 = vmatmul.bf16.gmra.mxu1 %v2379_v50  ;;  %v2483_v50 = vor.u32 %v2962_v47, %v2480_v48 }
  0x3f   :  { %793 = vmatmul.bf16.gmra.mxu2 %v2383_v53  ;;  %v2961_v53 = vld [vmem:[%s4615_s0 + $0xe4] sm:$0xf] }
  0x40   :  { %2662 = vmatmul.msk.bf16.gmra.mxu3 %vm594_vm0, %v2403_v54  ;;  %v2472_v54 = vld [vmem:[%s4615_s0 + $0xf0] sm:$0xf0] }
  0x41   :  { %v2475_v58 = vor.u32 %v2961_v53, %v2472_v54 }
  0x4d   :  { %652 = vmatmul.bf16.gmra.mxu0 %v2391_v61  ;;  %v2479_v61 = vor.u32 %v2964_v56, %v2478_v55 }
  0x4e   :  { %725 = vmatmul.bf16.gmra.mxu1 %v2395_v62  ;;  %v2499_v62 = vor.u32 %v2966_v59, %v2496_v60  ;;  %v2973_v59 = vld [vmem:[%s4615_s0 + $0x144] sm:$0xf]  ;;  %v2520_v60 = vld [vmem:[%s4615_s0 + $0x150] sm:$0xf0] }
  0x4f   :  { %798 = vmatmul.bf16.gmra.mxu2 %v2399_v1  ;;  %v2967_v1 = vld [vmem:[%s4615_s0 + $0x10c] sm:$0xf0] }
  0x50   :  { %2663 = vmatmul.msk.bf16.gmra.mxu3 %vm594_vm0, %v2419_v2  ;;  %v2965_v2 = vld [vmem:[%s4615_s0 + $0x104] sm:$0xf]  ;;  %v2487_v7 = vor.u32 %v2967_v1, %v2486_v0 }
  0x51   :  { %v2491_v8 = vor.u32 %v2965_v2, %v2488_v3  ;;  %v2523_v3 = vor.u32 %v2973_v59, %v2520_v60 }
  0x5d   :  { %657 = vmatmul.bf16.gmra.mxu0 %v2407_v9  ;;  %v2970_v9 = vld [vmem:[%s4615_s0 + $0x12c] sm:$0xf] }
  0x5e   :  { %730 = vmatmul.bf16.gmra.mxu1 %v2411_v10  ;;  %v2512_v10 = vld [vmem:[%s4615_s0 + $0x138] sm:$0xf0] }
  0x5f   :  { %803 = vmatmul.bf16.gmra.mxu2 %v2415_v13  ;;  %v2495_v13 = vor.u32 %v2968_v6, %v2494_v5  ;;  %v2515_v16 = vor.u32 %v2970_v9, %v2512_v10  ;;  %v2978_v5 = vld [vmem:[%s4615_s0 + $0x16c] sm:$0xf]  ;;  %v2544_v6 = vld [vmem:[%s4615_s0 + $0x178] sm:$0xf0] }
  0x60   :  { %2664 = vmatmul.msk.bf16.gmra.mxu3 %vm594_vm0, %v2435_v14 }
  0x6d   :  { %662 = vmatmul.bf16.gmra.mxu0 %v2423_v21 }
  0x6e   :  { %735 = vmatmul.bf16.gmra.mxu1 %v2427_v22 }
  0x6f   :  { %808 = vmatmul.bf16.gmra.mxu2 %v2431_v25 }
  0x70   :  { %2665 = vmatmul.msk.bf16.gmra.mxu3 %vm594_vm0, %v2451_v26  ;;  %v2502_v26 = vld [vmem:[%s4615_s0 + $0x120] sm:$0xf] }
  0x7d   :  { %667 = vmatmul.bf16.gmra.mxu0 %v2439_v33 }
  0x7e   :  { %740 = vmatmul.bf16.gmra.mxu1 %v2443_v34  ;;  %v2503_v34 = vor.u32 %v2971_v27, %v2502_v26  ;;  %v2979_v26 = vld [vmem:[%s4615_s0 + $0x16c] sm:$0xf0]  ;;  %v2977_v27 = vld [vmem:[%s4615_s0 + $0x164] sm:$0xf] }
  0x7f   :  { %813 = vmatmul.bf16.gmra.mxu2 %v2447_v37  ;;  %v2528_v37 = vld [vmem:[%s4615_s0 + $0x158] sm:$0xf0] }
  0x80   :  { %2666 = vmatmul.msk.bf16.gmra.mxu3 %vm594_vm0, %v2467_v38 }
  0x8d   :  { %672 = vmatmul.bf16.gmra.mxu0 %v2455_v45 }
  0x8e   :  { %745 = vmatmul.bf16.gmra.mxu1 %v2459_v46  ;;  %v2531_v46 = vor.u32 %v2974_v36, %v2528_v37  ;;  %v2543_v37 = vor.u32 %v2980_v30, %v2542_v29 }
  0x8f   :  { %818 = vmatmul.bf16.gmra.mxu2 %v2463_v49 }
  0x90   :  { %2667 = vmatmul.msk.bf16.gmra.mxu3 %vm594_vm0, %v2483_v50 }
  0x9d   :  { %677 = vmatmul.bf16.gmra.mxu0 %v2471_v57  ;;  %v2518_v57 = vld [vmem:[%s4615_s0 + $0x140] sm:$0xf] }
  0x9e   :  { %750 = vmatmul.bf16.gmra.mxu1 %v2475_v58  ;;  %v2975_v58 = vld [vmem:[%s4615_s0 + $0x14c] sm:$0xf0] }
  0x9f   :  { %823 = vmatmul.bf16.gmra.mxu2 %v2479_v61  ;;  %v2526_v61 = vld [vmem:[%s4615_s0 + $0x148] sm:$0xf]  ;;  %v2519_v2 = vor.u32 %v2975_v58, %v2518_v57 }
  0xa0   :  { %2668 = vmatmul.msk.bf16.gmra.mxu3 %vm594_vm0, %v2499_v62  ;;  %v2976_v62 = vld [vmem:[%s4615_s0 + $0x154] sm:$0xf0] }
  0xa1   :  { %v2527_v10 = vor.u32 %v2976_v62, %v2526_v61 }
  0xa3   :  { %v862_v63 = vpop.f32.mrf.mxu3 }
  0xaa   :  { %v643_v11 = vpop.f32.mrf.mxu0 }
  0xab   :  { %v716_v12 = vpop.f32.mrf.mxu1  ;;  %v644_v14 = vadd.f32 %v3766_v4, %v643_v11  ;;  %v864_v15 = vpop.f32.mrf.mxu3 }
  0xad   :  { %v717_v17 = vadd.f32 %v716_v12, %v644_v14  ;;  %682 = vmatmul.bf16.gmra.mxu0 %v2487_v7 }
  0xae   :  { %755 = vmatmul.bf16.gmra.mxu1 %v2491_v8 }
  0xaf   :  { %828 = vmatmul.bf16.gmra.mxu2 %v2495_v13 }
  0xb0   :  { %2669 = vmatmul.msk.bf16.gmra.mxu3 %vm594_vm0, %v2515_v16 }
  0xb2   :  { %v789_v18 = vpop.f32.mrf.mxu2  ;;  %v645_v20 = vpop.f32.mrf.mxu0 }
  0xb3   :  { %v790_v19 = vadd.f32 %v789_v18, %v717_v17  ;;  %v718_v21 = vpop.f32.mrf.mxu1  ;;  %v646_v22 = vadd.f32 %v3766_v4, %v645_v20  ;;  %v867_v23 = vpop.f32.mrf.mxu3 }
  0xb5   :  { %v863_v24 = vadd.f32 %v862_v63, %v790_v19  ;;  %v719_v25 = vadd.f32 %v718_v21, %v646_v22 }
  0xb7   :  { %v951_v28 = vmin.f32 %v863_v24, 0.0  ;;  %vm926_vm1 = vcmp.gt.f32.partialorder %v863_v24, 0.0 }
  0xb9   :  { %v976_v38 = vmul.f32 1.442695, %v951_v28  ;;  %v2536_v28 = vld [vmem:[%s4615_s0 + $0x170] sm:$0xf0] }
  0xba   :  { %v791_v33 = vpop.f32.mrf.mxu2  ;;  %v648_v40 = vpop.f32.mrf.mxu0 }
  0xbb   :  { %v792_v39 = vadd.f32 %v791_v33, %v719_v25  ;;  %v721_v41 = vpop.f32.mrf.mxu1  ;;  %v649_v43 = vadd.f32 %v3766_v4, %v648_v40  ;;  %v3808_v44 = vpop.f32.mrf.mxu3  ;;  %3225 = vpow2.f32 %v976_v38  ;;  %v124_v25 = vld [vmem:[%s4615_s0 + $0x188] sm:$0x11] }
  0xbc   :  { %v334_v31 = vunpack.c.h.b16 %v124_v25 }
  0xbd   :  { %v865_v45 = vadd.f32 %v864_v15, %v792_v39  ;;  %v722_v47 = vadd.f32 %v721_v41, %v649_v43  ;;  %687 = vmatmul.bf16.gmra.mxu0 %v2503_v34  ;;  %v2547_v15 = vor.u32 %v2978_v5, %v2544_v6  ;;  %v2539_v34 = vor.u32 %v2977_v27, %v2536_v28 }
  0xbe   :  { %760 = vmatmul.bf16.gmra.mxu1 %v2507_v35  ;;  %v386_v40 = vpack.c.b16 %v334_v31, %v334_v31 }
  0xbf   :  { %v952_v48 = vmin.f32 %v865_v45, 0.0  ;;  %833 = vmatmul.bf16.gmra.mxu2 %v2511_v42  ;;  %vm927_vm2 = vcmp.gt.f32.partialorder %v865_v45, 0.0 }
  0xc0   :  { %2670 = vmatmul.msk.bf16.gmra.mxu3 %vm594_vm0, %v2531_v46 }
  0xc1   :  { %v978_v49 = vmul.f32 1.442695, %v952_v48  ;;  %v3226_v55 = vpop.eup %3225 }
  0xc2   :  { %v794_v50 = vpop.f32.mrf.mxu2  ;;  %v3811_v52 = vpop.f32.mrf.mxu0  ;;  %v2673_v63 = vadd.f32 -1.0, %v3226_v55 }
  0xc3   :  { %v795_v51 = vadd.f32 %v794_v50, %v722_v47  ;;  %v3813_v53 = vpop.f32.mrf.mxu1  ;;  %3227 = vpow2.f32 %v978_v49  ;;  %v872_v54 = vpop.f32.mrf.mxu3  ;;  %v123_v47 = vld [vmem:[%s4615_s0 + $0x180] sm:$0x11] }
  0xc4   :  { %v3846_v13 = vsel %vm926_vm1, %v863_v24, %v2673_v63  ;;  %v2534_v24 = vld [vmem:[%s4615_s0 + $0x160] sm:$0xf]  ;;  %v331_v50 = vunpack.c.l.b16 %v123_v47 }
  0xc5   :  { %v3815_v56 = vadd.f32 %v867_v23, %v795_v51  ;;  %v2535_v33 = vor.u32 %v2979_v26, %v2534_v24  ;;  %v332_v51 = vunpack.c.h.b16 %v123_v47 }
  0xc6   :  { %v383_v57 = vpack.c.b16 %v331_v50, %v331_v50 }
  0xc7   :  { %v384_v58 = vpack.c.b16 %v332_v51, %v332_v51  ;;  %vm928_vm1 = vcmp.gt.f32.partialorder %v3815_v56, 0.0 }
  0xc9   :  { %v3228_v0 = vpop.eup %3227 }
  0xca   :  { %v3835_v1 = vpop.f32.mrf.mxu2  ;;  %v2674_v7 = vadd.f32 -1.0, %v3228_v0  ;;  %v653_v8 = vpop.f32.mrf.mxu0 }
  0xcb   :  { %v726_v9 = vpop.f32.mrf.mxu1  ;;  %v654_v11 = vadd.f32 %v3766_v4, %v653_v8  ;;  %v3844_v12 = vpop.f32.mrf.mxu3 }
  0xcc   :  { %v3848_v14 = vsel %vm927_vm2, %v865_v45, %v2674_v7 }
  0xcd   :  { %v1082_v16 = vpack.c.bf16 %v3848_v14, %v3846_v13  ;;  %v727_v17 = vadd.f32 %v726_v9, %v654_v11  ;;  %692 = vmatmul.bf16.gmra.mxu0 %v2519_v2  ;;  %v2700_v13 = vld [vmem:[%s4618_s3] sm:$0xf]  ;;  %v3010_v14 = vld [vmem:[%s4618_s3 + $0x4] sm:$0xf0] }
  0xce   :  { %765 = vmatmul.bf16.gmra.mxu1 %v2523_v3 }
  0xcf   :  { %838 = vmatmul.bf16.gmra.mxu2 %v2527_v10 }
  0xd0   :  { %2671 = vmatmul.msk.bf16.gmra.mxu3 %vm594_vm0, %v2547_v15 }
  0xd2   :  { %v799_v18 = vpop.f32.mrf.mxu2  ;;  %v3853_v20 = vpop.f32.mrf.mxu0 }
  0xd3   :  { %v800_v19 = vadd.f32 %v799_v18, %v727_v17  ;;  %v3855_v21 = vpop.f32.mrf.mxu1  ;;  %v877_v22 = vpop.f32.mrf.mxu3 }
  0xd5   :  { %v3857_v23 = vadd.f32 %v872_v54, %v800_v19  ;;  %v333_v54 = vunpack.c.l.b16 %v124_v25 }
  0xd7   :  { %v385_v61 = vpack.c.b16 %v333_v54, %v333_v54  ;;  %vm930_vm14 = vcmp.gt.f32.partialorder %v3857_v23, 0.0 }
  0xda   :  { %v3880_v32 = vpop.f32.mrf.mxu2  ;;  %v658_v35 = vpop.f32.mrf.mxu0 }
  0xdb   :  { %v731_v36 = vpop.f32.mrf.mxu1  ;;  %v659_v38 = vadd.f32 %v3766_v4, %v658_v35  ;;  %v3883_v39 = vpop.f32.mrf.mxu3 }
  0xdd   :  { %v732_v41 = vadd.f32 %v731_v36, %v659_v38  ;;  %697 = vmatmul.bf16.gmra.mxu0 %v2535_v33 }
  0xde   :  { %770 = vmatmul.bf16.gmra.mxu1 %v2539_v34 }
  0xdf   :  { %843 = vmatmul.bf16.gmra.mxu2 %v2543_v37 }
  0xe0   :  { %2672 = vmatmul.msk.bf16.gmra.mxu3 %vm594_vm0, %v386_v40 }
  0xe2   :  { %v804_v42 = vpop.f32.mrf.mxu2  ;;  %v3886_v45 = vpop.f32.mrf.mxu0 }
  0xe3   :  { %v805_v43 = vadd.f32 %v804_v42, %v732_v41  ;;  %v3888_v46 = vpop.f32.mrf.mxu1  ;;  %v882_v48 = vpop.f32.mrf.mxu3 }
  0xe5   :  { %v3893_v49 = vadd.f32 %v877_v22, %v805_v43 }
  0xe7   :  { %vm932_vm12 = vcmp.gt.f32.partialorder %v3893_v49, 0.0 }
  0xea   :  { %v3895_v55 = vpop.f32.mrf.mxu2  ;;  %v663_v59 = vpop.f32.mrf.mxu0 }
  0xeb   :  { %v736_v60 = vpop.f32.mrf.mxu1  ;;  %v664_v62 = vadd.f32 %v3766_v4, %v663_v59  ;;  %v3898_v63 = vpop.f32.mrf.mxu3 }
  0xed   :  { %v737_v0 = vadd.f32 %v736_v60, %v664_v62  ;;  %702 = vmatmul.bf16.gmra.mxu0 %v383_v57 }
  0xee   :  { %775 = vmatmul.bf16.gmra.mxu1 %v384_v58 }
  0xef   :  { %848 = vmatmul.bf16.gmra.mxu2 %v385_v61 }
  0xf2   :  { %v809_v2 = vpop.f32.mrf.mxu2  ;;  %v665_v5 = vpop.f32.mrf.mxu0 }
  0xf3   :  { %v810_v3 = vadd.f32 %v809_v2, %v737_v0  ;;  %v738_v6 = vpop.f32.mrf.mxu1  ;;  %v887_v7 = vpop.f32.mrf.mxu3  ;;  %v666_v57 = vadd.f32 %v3766_v4, %v665_v5 }
  0xf5   :  { %v3900_v8 = vadd.f32 %v882_v48, %v810_v3 }
  0xf7   :  { %vm934_vm10 = vcmp.gt.f32.partialorder %v3900_v8, 0.0 }
  0xfa   :  { %v811_v9 = vpop.f32.mrf.mxu2  ;;  %v668_v10 = vpop.f32.mrf.mxu0 }
  0xfb   :  { %v741_v11 = vpop.f32.mrf.mxu1  ;;  %v889_v15 = vpop.f32.mrf.mxu3  ;;  %v669_v42 = vadd.f32 %v3766_v4, %v668_v10 }
  0xfd   :  { %v742_v58 = vadd.f32 %v741_v11, %v669_v42 }
 0x102   :  { %v814_v17 = vpop.f32.mrf.mxu2  ;;  %v670_v18 = vpop.f32.mrf.mxu0 }
 0x103   :  { %v743_v19 = vpop.f32.mrf.mxu1  ;;  %v892_v22 = vpop.f32.mrf.mxu3  ;;  %v671_v43 = vadd.f32 %v3766_v4, %v670_v18  ;;  %v661_v18 = vadd.f32 %v3766_v4, %v3886_v45  ;;  %v815_v5 = vadd.f32 %v814_v17, %v742_v58 }
 0x105   :  { %v744_v59 = vadd.f32 %v743_v19, %v671_v43 }
 0x10a   :  { %v816_v24 = vpop.f32.mrf.mxu2  ;;  %v673_v25 = vpop.f32.mrf.mxu0 }
 0x10b   :  { %v746_v26 = vpop.f32.mrf.mxu1  ;;  %v894_v27 = vpop.f32.mrf.mxu3  ;;  %v674_v33 = vadd.f32 %v3766_v4, %v673_v25  ;;  %v817_v2 = vadd.f32 %v816_v24, %v744_v59 }
 0x10d   :  { %v747_v41 = vadd.f32 %v746_v26, %v674_v33 }
 0x112   :  { %v819_v28 = vpop.f32.mrf.mxu2  ;;  %v675_v29 = vpop.f32.mrf.mxu0 }
 0x113   :  { %v748_v30 = vpop.f32.mrf.mxu1  ;;  %v897_v31 = vpop.f32.mrf.mxu3  ;;  %v676_v35 = vadd.f32 %v3766_v4, %v675_v29  ;;  %v820_v51 = vadd.f32 %v819_v28, %v747_v41  ;;  %v739_v28 = vadd.f32 %v738_v6, %v666_v57  ;;  %v3918_v29 = vadd.f32 %v889_v15, %v817_v2 }
 0x114   :  { %v959_v57 = vmin.f32 %v3900_v8, 0.0 }
 0x115   :  { %v749_v47 = vadd.f32 %v748_v30, %v676_v35  ;;  %v3915_v26 = vadd.f32 %v892_v22, %v820_v51  ;;  %v812_v19 = vadd.f32 %v811_v9, %v739_v28  ;;  %v656_v30 = vadd.f32 %v3766_v4, %v3853_v20 }
 0x116   :  { %v3925_v22 = vadd.f32 %v887_v7, %v815_v5  ;;  %v651_v9 = vadd.f32 %v3766_v4, %v3811_v52  ;;  %v957_v28 = vmin.f32 %v3893_v49, 0.0  ;;  %v992_v5 = vmul.f32 1.442695, %v959_v57 }
 0x117   :  { %v963_v33 = vmin.f32 %v3915_v26, 0.0  ;;  %v3934_v20 = vadd.f32 %v3898_v63, %v812_v19  ;;  %v729_v41 = vadd.f32 %v3855_v21, %v656_v30  ;;  %vm938_vm6 = vcmp.gt.f32.partialorder %v3915_v26, 0.0 }
 0x118   :  { %vm937_vm7 = vcmp.gt.f32.partialorder %v3918_v29, 0.0  ;;  %vm936_vm8 = vcmp.gt.f32.partialorder %v3925_v22, 0.0 }
 0x119   :  { %v1000_v42 = vmul.f32 1.442695, %v963_v33  ;;  %v960_v63 = vmin.f32 %v3934_v20, 0.0  ;;  %vm935_vm9 = vcmp.gt.f32.partialorder %v3934_v20, 0.0 }
 0x11a   :  { %v821_v34 = vpop.f32.mrf.mxu2  ;;  %v678_v36 = vpop.f32.mrf.mxu0 }
 0x11b   :  { %v751_v37 = vpop.f32.mrf.mxu1  ;;  %v679_v38 = vadd.f32 %v3766_v4, %v678_v36  ;;  %v899_v40 = vpop.f32.mrf.mxu3  ;;  %v822_v50 = vadd.f32 %v821_v34, %v749_v47  ;;  %v961_v47 = vmin.f32 %v3925_v22, 0.0 }
 0x11d   :  { %v752_v48 = vadd.f32 %v751_v37, %v679_v38  ;;  %v3908_v3 = vadd.f32 %v894_v27, %v822_v50  ;;  %v996_v58 = vmul.f32 1.442695, %v961_v47 }
 0x11f   :  { %v964_v24 = vmin.f32 %v3908_v3, 0.0  ;;  %vm939_vm5 = vcmp.gt.f32.partialorder %v3908_v3, 0.0 }
 0x121   :  { %v1002_v7 = vmul.f32 1.442695, %v964_v24 }
 0x122   :  { %v824_v54 = vpop.f32.mrf.mxu2  ;;  %v680_v61 = vpop.f32.mrf.mxu0 }
 0x123   :  { %v825_v60 = vadd.f32 %v824_v54, %v752_v48  ;;  %v753_v62 = vpop.f32.mrf.mxu1  ;;  %v902_v0 = vpop.f32.mrf.mxu3  ;;  %v681_v10 = vadd.f32 %v3766_v4, %v680_v61  ;;  %v802_v48 = vadd.f32 %v3880_v32, %v729_v41 }
 0x125   :  { %v3910_v25 = vadd.f32 %v897_v31, %v825_v60  ;;  %v754_v27 = vadd.f32 %v753_v62, %v681_v10  ;;  %v734_v31 = vadd.f32 %v3888_v46, %v661_v18  ;;  %v962_v46 = vmin.f32 %v3918_v29, 0.0 }
 0x126   :  { %v3952_v32 = vadd.f32 %v3844_v12, %v802_v48  ;;  %v953_v48 = vmin.f32 %v3815_v56, 0.0 }
 0x127   :  { %v965_v11 = vmin.f32 %v3910_v25, 0.0  ;;  %v807_v15 = vadd.f32 %v3895_v55, %v734_v31  ;;  %v724_v55 = vadd.f32 %v3813_v53, %v651_v9  ;;  %v998_v51 = vmul.f32 1.442695, %v962_v46 }
 0x128   :  { %v956_v24 = vmin.f32 %v3952_v32, 0.0  ;;  %vm940_vm3 = vcmp.gt.f32.partialorder %v3910_v25, 0.0  ;;  %vm931_vm13 = vcmp.gt.f32.partialorder %v3952_v32, 0.0 }
 0x129   :  { %v1004_v6 = vmul.f32 1.442695, %v965_v11  ;;  %v3942_v50 = vadd.f32 %v3883_v39, %v807_v15  ;;  %v797_v21 = vadd.f32 %v3835_v1, %v724_v55  ;;  %v994_v1 = vmul.f32 1.442695, %v960_v63 }
 0x12a   :  { %v826_v45 = vpop.f32.mrf.mxu2  ;;  %v683_v34 = vpop.f32.mrf.mxu0  ;;  %v986_v41 = vmul.f32 1.442695, %v956_v24 }
 0x12b   :  { %v827_v17 = vadd.f32 %v826_v45, %v754_v27  ;;  %v756_v35 = vpop.f32.mrf.mxu1  ;;  %v684_v36 = vadd.f32 %v3766_v4, %v683_v34  ;;  %v3931_v37 = vpop.f32.mrf.mxu3  ;;  %3229 = vpow2.f32 %v1004_v6  ;;  %v958_v62 = vmin.f32 %v3942_v50, 0.0 }
 0x12c   :  { %3231 = vpow2.f32 %v1002_v7  ;;  %v3960_v10 = vadd.f32 %v3808_v44, %v797_v21  ;;  %v988_v6 = vmul.f32 1.442695, %v957_v28  ;;  %vm933_vm11 = vcmp.gt.f32.partialorder %v3942_v50, 0.0 }
 0x12d   :  { %v900_v38 = vadd.f32 %v899_v40, %v827_v17  ;;  %v757_v43 = vadd.f32 %v756_v35, %v684_v36  ;;  %3233 = vpow2.f32 %v1000_v42  ;;  %v990_v27 = vmul.f32 1.442695, %v958_v62 }
 0x12e   :  { %v954_v30 = vmin.f32 %v3960_v10, 0.0  ;;  %vm929_vm15 = vcmp.gt.f32.partialorder %v3960_v10, 0.0 }
 0x12f   :  { %v966_v52 = vmin.f32 %v900_v38, 0.0  ;;  %vm941_vm4 = vcmp.gt.f32.partialorder %v900_v38, 0.0 }
 0x131   :  { %v1006_v54 = vmul.f32 1.442695, %v966_v52  ;;  %v3230_v61 = vpop.eup %3229 }
 0x132   :  { %v829_v40 = vpop.f32.mrf.mxu2  ;;  %v3947_v60 = vpop.f32.mrf.mxu0  ;;  %v2687_v12 = vadd.f32 -1.0, %v3230_v61 }
 0x133   :  { %v830_v59 = vadd.f32 %v829_v40, %v757_v43  ;;  %v3949_v53 = vpop.f32.mrf.mxu1  ;;  %3235 = vpow2.f32 %v1006_v54  ;;  %v3954_v39 = vpop.f32.mrf.mxu3  ;;  %v982_v54 = vmul.f32 1.442695, %v954_v30 }
 0x134   :  { %3237 = vpow2.f32 %v998_v51  ;;  %v3232_v18 = vpop.eup %3231  ;;  %v1065_v9 = vsel %vm940_vm3, %v3910_v25, %v2687_v12  ;;  %vm1132_vm3 = vcmask 1040384  }
 0x135   :  { %v3957_v2 = vadd.f32 %v902_v0, %v830_v59  ;;  %3239 = vpow2.f32 %v996_v58  ;;  %v3234_v11 = vpop.eup %3233  ;;  %v955_v0 = vmin.f32 %v3857_v23, 0.0  ;;  %v2686_v33 = vadd.f32 -1.0, %v3232_v18 }
 0x136   :  { %3241 = vpow2.f32 %v994_v1  ;;  %v2685_v36 = vadd.f32 -1.0, %v3234_v11  ;;  %v980_v59 = vmul.f32 1.442695, %v953_v48 }
 0x137   :  { %3243 = vpow2.f32 %v992_v5  ;;  %v1064_v47 = vsel %vm939_vm5, %v3908_v3, %v2686_v33  ;;  %v984_v63 = vmul.f32 1.442695, %v955_v0 }
 0x138   :  { %3245 = vpow2.f32 %v990_v27  ;;  %v1063_v25 = vsel %vm938_vm6, %v3915_v26, %v2685_v36 }
 0x139   :  { %v3236_v19 = vpop.eup %3235  ;;  %3247 = vpow2.f32 %v988_v6  ;;  %v1088_v21 = vpack.c.bf16 %v1064_v47, %v1063_v25 }
 0x13a   :  { %v3966_v31 = vpop.f32.mrf.mxu2  ;;  %v2688_v44 = vadd.f32 -1.0, %v3236_v19  ;;  %v3238_v45 = vpop.eup %3237  ;;  %3249 = vpow2.f32 %v986_v41 }
 0x13b   :  { %v688_v17 = vpop.f32.mrf.mxu0  ;;  %v761_v34 = vpop.f32.mrf.mxu1  ;;  %v2684_v52 = vadd.f32 -1.0, %v3238_v45  ;;  %3251 = vpow2.f32 %v984_v63 }
 0x13c   :  { %v689_v35 = vadd.f32 %v3766_v4, %v688_v17  ;;  %v1066_v15 = vsel %vm941_vm4, %v900_v38, %v2688_v44  ;;  %v3971_v46 = vpop.f32.mrf.mxu3  ;;  %v3240_v7 = vpop.eup %3239  ;;  %3253 = vpow2.f32 %v982_v54 }
 0x13d   :  { %v1089_v42 = vpack.c.bf16 %v1066_v15, %v1065_v9  ;;  %v3242_v55 = vpop.eup %3241  ;;  %v2683_v38 = vadd.f32 -1.0, %v3240_v7  ;;  %v1062_v3 = vsel %vm937_vm7, %v3918_v29, %v2684_v52  ;;  %3255 = vpow2.f32 %v980_v59 }
 0x13e   :  { %v762_v43 = vadd.f32 %v761_v34, %v689_v35  ;;  %v3244_v51 = vpop.eup %3243  ;;  %v2682_v57 = vadd.f32 -1.0, %v3242_v55 }
 0x13f   :  { %1136 = vmatpush.bf16.msrb.mxu3 %v1089_v42  ;;  %v3246_v58 = vpop.eup %3245  ;;  %v1061_v26 = vsel %vm936_vm8, %v3925_v22, %v2683_v38  ;;  %v2681_v18 = vadd.f32 -1.0, %v3244_v51 }
 0x140   :  { %v3248_v5 = vpop.eup %3247  ;;  %v1087_v11 = vpack.c.bf16 %v1062_v3, %v1061_v26  ;;  %v1060_v12 = vsel %vm935_vm9, %v3934_v20, %v2682_v57  ;;  %v2680_v19 = vadd.f32 -1.0, %v3246_v58 }
 0x141   :  { %v3250_v24 = vpop.eup %3249  ;;  %v1059_v22 = vsel %vm934_vm10, %v3900_v8, %v2681_v18  ;;  %v2679_v27 = vadd.f32 -1.0, %v3248_v5  ;;  %v2701_v5 = vor.u32 %v3010_v14, %v2700_v13 }
 0x142   :  { %v834_v40 = vpop.f32.mrf.mxu2  ;;  %v3252_v30 = vpop.eup %3251  ;;  %v1086_v0 = vpack.c.bf16 %v1060_v12, %v1059_v22  ;;  %v1058_v44 = vsel %vm933_vm11, %v3942_v50, %v2680_v19  ;;  %v2678_v33 = vadd.f32 -1.0, %v3250_v24  ;;  %vm942_vm11 = vcmp.gt.f32.partialorder %v3957_v2, 0.0 }
 0x143   :  { %v835_v61 = vadd.f32 %v834_v40, %v762_v43  ;;  %1137 = vmatpush.bf16.msrb.mxu3 %v1088_v21  ;;  %v3980_v62 = vpop.f32.mrf.mxu0  ;;  %v3982_v1 = vpop.f32.mrf.mxu1  ;;  %v1057_v17 = vsel %vm932_vm12, %v3893_v49, %v2679_v27  ;;  %v2677_v34 = vadd.f32 -1.0, %v3252_v30  ;;  %vm1122_vm12 = vcmask 539648  }
 0x144   :  { %v3986_v28 = vpop.f32.mrf.mxu3  ;;  %v3254_v45 = vpop.eup %3253  ;;  %v1085_v9 = vpack.c.bf16 %v1058_v44, %v1057_v17  ;;  %v1056_v15 = vsel %vm931_vm13, %v3952_v32, %v2678_v33  ;;  %v686_v44 = vadd.f32 %v3766_v4, %v3947_v60  ;;  %vm1184_vm13 = vcmask 261120  }
 0x145   :  { %v3989_v29 = vadd.f32 %v3954_v39, %v835_v61  ;;  %v3256_v35 = vpop.eup %3255  ;;  %v2676_v36 = vadd.f32 -1.0, %v3254_v45  ;;  %v1055_v50 = vsel %vm930_vm14, %v3857_v23, %v2677_v34  ;;  %vm1376_vm14 = vcmask 1042432  }
 0x146   :  { %v2675_v7 = vadd.f32 -1.0, %v3256_v35  ;;  %v1084_v41 = vpack.c.bf16 %v1056_v15, %v1055_v50 }
 0x147   :  { %1138 = vmatpush.bf16.msrb.mxu3 %v1087_v11  ;;  %v1054_v49 = vsel %vm929_vm15, %v3960_v10, %v2676_v36  ;;  %v759_v36 = vadd.f32 %v3949_v53, %v686_v44  ;;  %vm944_vm9 = vcmp.gt.f32.partialorder %v3989_v29, 0.0  ;;  %vm1421_vm15 = vcmask 1041408  }
 0x148   :  { %v1053_v32 = vsel %vm928_vm1, %v3815_v56, %v2675_v7  ;;  %vm1259_vm1 = vcmask 1045504  }
 0x149   :  { %v1083_v55 = vpack.c.bf16 %v1054_v49, %v1053_v32 }
 0x14a   :  { %v3996_v39 = vpop.f32.mrf.mxu2 }
 0x14b   :  { %1139 = vmatpush.bf16.msrb.mxu3 %v1086_v0  ;;  %v693_v20 = vpop.f32.mrf.mxu0  ;;  %v766_v6 = vpop.f32.mrf.mxu1 }
 0x14c   :  { %v914_v8 = vpop.f32.mrf.mxu3  ;;  %v694_v56 = vadd.f32 %v3766_v4, %v693_v20 }
 0x14e   :  { %v767_v11 = vadd.f32 %v766_v6, %v694_v56 }
 0x14f   :  { %1140 = vmatpush.bf16.msrb.mxu3 %v1085_v9 }
 0x152   :  { %v839_v42 = vpop.f32.mrf.mxu2 }
 0x153   :  { %1141 = vmatpush.bf16.msrb.mxu3 %v1084_v41  ;;  %v695_v43 = vpop.f32.mrf.mxu0  ;;  %v768_v47 = vpop.f32.mrf.mxu1  ;;  %v840_v33 = vadd.f32 %v839_v42, %v767_v11 }
 0x154   :  { %v917_v52 = vpop.f32.mrf.mxu3  ;;  %v696_v3 = vadd.f32 %v3766_v4, %v695_v43 }
 0x155   :  { %v4038_v50 = vadd.f32 %v3986_v28, %v840_v33 }
 0x156   :  { %v769_v12 = vadd.f32 %v768_v47, %v696_v3 }
 0x157   :  { %1142 = vmatpush.bf16.msrb.mxu3 %v1083_v55  ;;  %v971_v42 = vmin.f32 %v4038_v50, 0.0  ;;  %vm946_vm7 = vcmp.gt.f32.partialorder %v4038_v50, 0.0 }
 0x159   :  { %v1016_v55 = vmul.f32 1.442695, %v971_v42 }
 0x15a   :  { %v841_v48 = vpop.f32.mrf.mxu2 }
 0x15b   :  { %1143 = vmatpush.bf16.msrb.mxu3 %v1082_v16  ;;  %v698_v23 = vpop.f32.mrf.mxu0  ;;  %v771_v63 = vpop.f32.mrf.mxu1  ;;  %v691_v16 = vadd.f32 %v3766_v4, %v3980_v62  ;;  %v842_v27 = vadd.f32 %v841_v48, %v769_v12 }
 0x15c   :  { %v919_v25 = vpop.f32.mrf.mxu3  ;;  %v699_v54 = vadd.f32 %v3766_v4, %v698_v23 }
 0x15d   :  { %v764_v62 = vadd.f32 %v3982_v1, %v691_v16  ;;  %v4033_v6 = vadd.f32 %v914_v8, %v842_v27  ;;  %v832_v1 = vadd.f32 %v3966_v31, %v759_v36  ;;  %v2708_v31 = vld [vmem:[%s4618_s3 + $0x10] sm:$0xf]  ;;  %v3014_v27 = vld [vmem:[%s4618_s3 + $0x24] sm:$0xf0]  ;;  %v2702_v36 = vld [vmem:[%s4618_s3 + $0x8] sm:$0xf0] }
 0x15e   :  { %v772_v57 = vadd.f32 %v771_v63, %v699_v54  ;;  %1144 = vmatmul.bf16.vlgmr.msrb.gmra.mxu3 %v2701_v5 }
 0x15f   :  { %v837_v20 = vadd.f32 %v3996_v39, %v764_v62  ;;  %v972_v8 = vmin.f32 %v4033_v6, 0.0  ;;  %v4048_v53 = vadd.f32 %v3931_v37, %v832_v1  ;;  %vm947_vm6 = vcmp.gt.f32.partialorder %v4033_v6, 0.0  ;;  %v2710_v1 = vld [vmem:[%s4618_s3 + $0x18] sm:$0xf0] }
 0x161   :  { %v4043_v39 = vadd.f32 %v3971_v46, %v837_v20  ;;  %v1018_v47 = vmul.f32 1.442695, %v972_v8  ;;  %v3012_v46 = vld [vmem:[%s4618_s3 + $0x14] sm:$0xf0]  ;;  %v968_v48 = vmin.f32 %v4048_v53, 0.0  ;;  %vm943_vm10 = vcmp.gt.f32.partialorder %v4048_v53, 0.0 }
 0x162   :  { %v844_v38 = vpop.f32.mrf.mxu2  ;;  %v2709_v37 = vor.u32 %v3012_v46, %v2708_v31  ;;  %v3013_v8 = vld [vmem:[%s4618_s3 + $0x24] sm:$0xf] }
 0x163   :  { %v700_v10 = vpop.f32.mrf.mxu0  ;;  %v773_v51 = vpop.f32.mrf.mxu1  ;;  %v845_v19 = vadd.f32 %v844_v38, %v772_v57  ;;  %v970_v28 = vmin.f32 %v4043_v39, 0.0  ;;  %v1010_v54 = vmul.f32 1.442695, %v968_v48  ;;  %vm945_vm8 = vcmp.gt.f32.partialorder %v4043_v39, 0.0 }
 0x164   :  { %v922_v21 = vpop.f32.mrf.mxu3  ;;  %v701_v40 = vadd.f32 %v3766_v4, %v700_v10 }
 0x165   :  { %v4030_v45 = vadd.f32 %v917_v52, %v845_v19  ;;  %v969_v52 = vmin.f32 %v3989_v29, 0.0  ;;  %v1014_v23 = vmul.f32 1.442695, %v970_v28 }
 0x166   :  { %v774_v58 = vadd.f32 %v773_v51, %v701_v40 }
 0x167   :  { %v1012_v38 = vmul.f32 1.442695, %v969_v52  ;;  %vm948_vm5 = vcmp.gt.f32.partialorder %v4030_v45, 0.0 }
 0x16a   :  { %v846_v59 = vpop.f32.mrf.mxu2 }
 0x16b   :  { %v847_v61 = vadd.f32 %v846_v59, %v774_v58  ;;  %v703_v26 = vpop.f32.mrf.mxu0  ;;  %v776_v18 = vpop.f32.mrf.mxu1 }
 0x16c   :  { %v704_v24 = vadd.f32 %v3766_v4, %v703_v26  ;;  %v924_v22 = vpop.f32.mrf.mxu3  ;;  %v973_v4 = vmin.f32 %v4030_v45, 0.0 }
 0x16d   :  { %v4025_v30 = vadd.f32 %v919_v25, %v847_v61  ;;  %v967_v25 = vmin.f32 %v3957_v2, 0.0  ;;  %v2716_v22 = vld [vmem:[%s4618_s3 + $0x20] sm:$0xf] }
 0x16e   :  { %v777_v0 = vadd.f32 %v776_v18, %v704_v24  ;;  %v1020_v49 = vmul.f32 1.442695, %v973_v4  ;;  %1149 = vmatmul.bf16.gmra.mxu3 %v2709_v37 }
 0x16f   :  { %v974_v17 = vmin.f32 %v4025_v30, 0.0  ;;  %v1008_v3 = vmul.f32 1.442695, %v967_v25  ;;  %vm949_vm4 = vcmp.gt.f32.partialorder %v4025_v30, 0.0 }
 0x171   :  { %v1022_v7 = vmul.f32 1.442695, %v974_v17 }
 0x172   :  { %v849_v34 = vpop.f32.mrf.mxu2 }
 0x173   :  { %v850_v35 = vadd.f32 %v849_v34, %v777_v0  ;;  %v705_v9 = vpop.f32.mrf.mxu0  ;;  %v778_v15 = vpop.f32.mrf.mxu1  ;;  %3257 = vpow2.f32 %v1022_v7  ;;  %v2717_v0 = vor.u32 %v3014_v27, %v2716_v22 }
 0x174   :  { %v3009_v15 = vld [vmem:[%s4618_s3 + $0x4] sm:$0xf] }
 0x175   :  { %v923_v60 = vadd.f32 %v922_v21, %v850_v35  ;;  %v2705_v4 = vor.u32 %v3009_v15, %v2702_v36 }
 0x177   :  { %v975_v41 = vmin.f32 %v923_v60, 0.0  ;;  %vm950_vm2 = vcmp.gt.f32.partialorder %v923_v60, 0.0 }
 0x179   :  { %v1024_v43 = vmul.f32 1.442695, %v975_v41  ;;  %v3258_v63 = vpop.eup %3257  ;;  %v3398_v41 = vmov 0.0  }
 0x17a   :  { %v851_v32 = vpop.f32.mrf.mxu2  ;;  %v2696_v40 = vadd.f32 -1.0, %v3258_v63  ;;  %1185 = vst.msk [vmem:[#allocation2] sm:$0xff] %vm1184_vm13, %v3398_v41 }
 0x17b   :  { %3259 = vpow2.f32 %v1024_v43  ;;  %1186 = vst.msk [vmem:[#allocation2 + $0x20] sm:$0xff] %vm1184_vm13, %v3398_v41 }
 0x17c   :  { %3261 = vpow2.f32 %v1020_v49  ;;  %v1074_v16 = vsel %vm949_vm4, %v4025_v30, %v2696_v40  ;;  %1190 = vst.msk [vmem:[#allocation2 + $0x28] sm:$0xff] %vm1184_vm13, %v3398_v41  ;;  %vm1304_vm4 = vcmask 1044480  }
 0x17d   :  { %3263 = vpow2.f32 %v1018_v47  ;;  %1191 = vst.msk [vmem:[#allocation2 + $0x48] sm:$0xff] %vm1184_vm13, %v3398_v41 }
 0x17e   :  { %3265 = vpow2.f32 %v1016_v55  ;;  %1154 = vmatmul.bf16.gmra.mxu3 %v2717_v0 }
 0x17f   :  { %3267 = vpow2.f32 %v1014_v23 }
 0x180   :  { %3269 = vpow2.f32 %v1012_v38 }
 0x181   :  { %v3260_v10 = vpop.eup %3259  ;;  %3271 = vpow2.f32 %v1010_v54  ;;  %v4107_v31 = vld [vmem:[#allocation2] sm:$0xff] }
 0x182   :  { %v3262_v51 = vpop.eup %3261  ;;  %v2697_v21 = vadd.f32 -1.0, %v3260_v10  ;;  %3273 = vpow2.f32 %v1008_v3  ;;  %v1466_v55 = vrot.slane %v4107_v31, 7  ;;  %v1377_v23 = vrot.slane %v4107_v31, 5 }
 0x183   :  { %v3264_v56 = vpop.eup %3263  ;;  %v2695_v59 = vadd.f32 -1.0, %v3262_v51  ;;  %v1215_v15 = vrot.slane %v4107_v31, 1  ;;  %v1260_v36 = vrot.slane %v4107_v31, 2 }
 0x184   :  { %v1075_v57 = vsel %vm950_vm2, %v923_v60, %v2697_v21  ;;  %v3266_v13 = vpop.eup %3265  ;;  %v2694_v61 = vadd.f32 -1.0, %v3264_v56  ;;  %v3011_v60 = vld [vmem:[%s4618_s3 + $0x14] sm:$0xf]  ;;  %vm1214_vm2 = vcmask 1046528  }
 0x185   :  { %v1094_v58 = vpack.c.bf16 %v1075_v57, %v1075_v57  ;;  %v3268_v26 = vpop.eup %3267  ;;  %v1073_v18 = vsel %vm948_vm5, %v4030_v45, %v2695_v59  ;;  %v2693_v5 = vadd.f32 -1.0, %v3266_v13  ;;  %v1422_v59 = vrot.slane %v4107_v31, 6 }
 0x186   :  { %v3270_v11 = vpop.eup %3269  ;;  %v1093_v12 = vpack.c.bf16 %v1074_v16, %v1073_v18  ;;  %v1072_v19 = vsel %vm947_vm6, %v4033_v6, %v2694_v61  ;;  %v2692_v24 = vadd.f32 -1.0, %v3268_v26  ;;  %vm1349_vm5 = vcmask 1043456  }
 0x187   :  { %v1134_v14 = vsel %vm1132_vm3, %v1094_v58, 0  ;;  %v3272_v30 = vpop.eup %3271  ;;  %v1071_v44 = vsel %vm946_vm7, %v4038_v50, %v2693_v5  ;;  %v2691_v62 = vadd.f32 -1.0, %v3270_v11  ;;  %vm1581_vm6 = vcmask 785408  }
 0x188   :  { %1163 = vmatpush.bf16.msrb.mxu0 %v1134_v14  ;;  %v3274_v33 = vpop.eup %3273  ;;  %v1092_v45 = vpack.c.bf16 %v1072_v19, %v1071_v44  ;;  %v1070_v20 = vsel %vm945_vm8, %v4043_v39, %v2692_v24  ;;  %v2690_v6 = vadd.f32 -1.0, %v3272_v30  ;;  %v2713_v39 = vor.u32 %v3011_v60, %v2710_v1 }
 0x189   :  { %v1069_v17 = vsel %vm944_vm9, %v3989_v29, %v2691_v62  ;;  %v2689_v34 = vadd.f32 -1.0, %v3274_v33 }
 0x18a   :  { %v1091_v35 = vpack.c.bf16 %v1070_v20, %v1069_v17  ;;  %v1068_v9 = vsel %vm943_vm10, %v4048_v53, %v2690_v6 }
 0x18b   :  { %v1067_v50 = vsel %vm942_vm11, %v3957_v2, %v2689_v34  ;;  %v2718_v2 = vld [vmem:[%s4618_s3 + $0x28] sm:$0xf0]  ;;  %s3399_s3 = smov 96  }
 0x18c   :  { %1164 = vmatpush.bf16.msrb.mxu0 %v1093_v12  ;;  %v1090_v29 = vpack.c.bf16 %v1068_v9, %v1067_v50  ;;  %v2721_v7 = vor.u32 %v3013_v8, %v2718_v2 }
 0x190   :  { %1165 = vmatpush.bf16.msrb.mxu0 %v1092_v45 }
 0x194   :  { %1166 = vmatpush.bf16.msrb.mxu0 %v1091_v35 }
 0x198   :  { %1167 = vmatpush.bf16.msrb.mxu0 %v1090_v29 }
 0x19b   :  { %2722 = vmatmul.msk.bf16.vlgmr.msrb.gmra.mxu0 %vm1122_vm12, %v2705_v4 }
 0x1ab   :  { %2723 = vmatmul.msk.bf16.gmra.mxu0 %vm1122_vm12, %v2713_v39  ;;  %v4159_v39 = vld [vmem:[#allocation2 + $0x20] sm:$0xff] }
 0x1bb   :  { %2724 = vmatmul.msk.bf16.gmra.mxu0 %vm1122_vm12, %v2721_v7 }
 0x1e1   :  { %v1145_v42 = vpop.f32.mrf.mxu3 }
 0x1e9   :  { %v1147_v53 = vpop.f32.mrf.mxu3 }
 0x1f1   :  { %v1150_v32 = vpop.f32.mrf.mxu3 }
 0x1f9   :  { %v1152_v57 = vpop.f32.mrf.mxu3 }
 0x201   :  { %v1155_v20 = vpop.f32.mrf.mxu3 }
 0x218   :  { %v1169_v49 = vpop.f32.mrf.mxu0 }
 0x219   :  { %v1170_v43 = vadd.f32 %v1169_v49, %v1145_v42  ;;  %v1157_v49 = vpop.f32.mrf.mxu3 }
 0x21b   :  { %1187 = vst.msk [vmem:[#allocation2 + $0x8] sm:$0xff] %vm1184_vm13, %v1170_v43 }
 0x220   :  { %v1171_v28 = vpop.f32.mrf.mxu0 }
 0x221   :  { %v1172_v47 = vadd.f32 %v1171_v28, %v1147_v53  ;;  %v1222_v28 = vrot.slane %v4159_v39, 1 }
 0x222   :  { %v4109_v46 = vld [vmem:[#allocation2 + $0x8] sm:$0xff] }
 0x223   :  { %1188 = vst.msk [vmem:[#allocation2 + $0x10] sm:$0xff] %vm1184_vm13, %v1172_v47  ;;  %v1467_v48 = vrot.slane %v4109_v46, 7  ;;  %v1378_v63 = vrot.slane %v4109_v46, 5  ;;  %v1423_v13 = vrot.slane %v4109_v46, 6  ;;  %v1261_v5 = vrot.slane %v4109_v46, 2 }
 0x224   :  { %v1216_v19 = vrot.slane %v4109_v46, 1  ;;  %v1306_v29 = vrot.slane %v4109_v46, 3  ;;  %v1384_v47 = vrot.slane %v4159_v39, 5 }
 0x225   :  { %v1468_v51 = vsel %vm1132_vm3, %v1466_v55, %v1467_v48  ;;  %v1379_v21 = vsel %vm1376_vm14, %v1377_v23, %v1378_v63  ;;  %v1424_v22 = vsel %vm1421_vm15, %v1422_v59, %v1423_v13  ;;  %v1262_v42 = vsel %vm1259_vm1, %v1260_v36, %v1261_v5 }
 0x226   :  { %v1217_v2 = vsel %vm1214_vm2, %v1215_v15, %v1216_v19 }
 0x228   :  { %v1174_v52 = vpop.f32.mrf.mxu0 }
 0x229   :  { %v1175_v37 = vadd.f32 %v1174_v52, %v1150_v32  ;;  %v1267_v32 = vrot.slane %v4159_v39, 2  ;;  %v1429_v52 = vrot.slane %v4159_v39, 6 }
 0x22a   :  { %v4115_v25 = vld [vmem:[#allocation2 + $0x10] sm:$0xff] }
 0x22b   :  { %1189 = vst.msk [vmem:[#allocation2 + $0x18] sm:$0xff] %vm1184_vm13, %v1175_v37  ;;  %v1469_v38 = vrot.slane %v4115_v25, 7  ;;  %v1380_v10 = vrot.slane %v4115_v25, 5  ;;  %v1425_v58 = vrot.slane %v4115_v25, 6  ;;  %v1263_v16 = vrot.slane %v4115_v25, 2 }
 0x22c   :  { %v1218_v61 = vrot.slane %v4115_v25, 1  ;;  %v1308_v9 = vrot.slane %v4115_v25, 3  ;;  %v1305_v37 = vrot.slane %v4107_v31, 3 }
 0x22d   :  { %v1470_v54 = vsel %vm1132_vm3, %v1467_v48, %v1469_v38  ;;  %v1381_v40 = vsel %vm1376_vm14, %v1378_v63, %v1380_v10  ;;  %v1426_v11 = vsel %vm1421_vm15, %v1423_v13, %v1425_v58  ;;  %v1264_v27 = vsel %vm1259_vm1, %v1261_v5, %v1263_v16 }
 0x22e   :  { %v3078_v56 = vpack.i.bf16 %v1470_v54, %v1468_v51  ;;  %v3068_v3 = vpack.i.bf16 %v1381_v40, %v1379_v21  ;;  %v1219_v0 = vsel %vm1214_vm2, %v1216_v19, %v1218_v61  ;;  %v3073_v62 = vpack.i.bf16 %v1426_v11, %v1424_v22  ;;  %v4182_v21 = vld [vmem:[#allocation2 + $0x28] sm:$0xff] }
 0x22f   :  { %v1309_v8 = vsel %vm1304_vm4, %v1306_v29, %v1308_v9  ;;  %v1307_v40 = vsel %vm1304_vm4, %v1305_v37, %v1306_v29  ;;  %v1386_v59 = vrot.slane %v4182_v21, 5  ;;  %v1473_v13 = vrot.slane %v4159_v39, 7 }
 0x230   :  { %3079 = vrot.lane.b32.xlu1 %v3078_v56, %s3399_s3  ;;  %3069 = vrot.lane.b32.xlu0 %v3068_v3, %s3400_s25  ;;  %v1176_v14 = vpop.f32.mrf.mxu0 }
 0x231   :  { %v1177_v26 = vadd.f32 %v1176_v14, %v1152_v57  ;;  %v1312_v57 = vrot.slane %v4159_v39, 3  ;;  %v1269_v14 = vrot.slane %v4182_v21, 2 }
 0x232   :  { %v4133_v18 = vld [vmem:[#allocation2 + $0x18] sm:$0xff] }
 0x233   :  { %v1265_v12 = vrot.slane %v4133_v18, 2  ;;  %v1220_v24 = vrot.slane %v4133_v18, 1  ;;  %1192 = vst.msk [vmem:[#allocation2 + $0x30] sm:$0xff] %vm1184_vm13, %v1177_v26  ;;  %v1310_v6 = vrot.slane %v4133_v18, 3  ;;  %v1382_v17 = vrot.slane %v4133_v18, 5 }
 0x234   :  { %v1427_v34 = vrot.slane %v4133_v18, 6  ;;  %v1471_v53 = vrot.slane %v4133_v18, 7  ;;  %v1387_v26 = vsel %vm1376_vm14, %v1384_v47, %v1386_v59  ;;  %v1270_v5 = vsel %vm1259_vm1, %v1267_v32, %v1269_v14 }
 0x235   :  { %v1266_v30 = vsel %vm1259_vm1, %v1263_v16, %v1265_v12  ;;  %v1221_v44 = vsel %vm1214_vm2, %v1218_v61, %v1220_v24  ;;  %v1311_v4 = vsel %vm1304_vm4, %v1308_v9, %v1310_v6  ;;  %v1383_v60 = vsel %vm1376_vm14, %v1380_v10, %v1382_v17 }
 0x236   :  { %v3088_v33 = vpack.i.bf16 %v1266_v30, %v1264_v27  ;;  %v3083_v45 = vpack.i.bf16 %v1221_v44, %v1219_v0  ;;  %v1428_v1 = vsel %vm1421_vm15, %v1425_v58, %v1427_v34  ;;  %v3098_v7 = vpack.i.bf16 %v1311_v4, %v1309_v8 }
 0x237   :  { %v3093_v41 = vpack.i.bf16 %v1383_v60, %v1217_v2  ;;  %v3103_v43 = vpack.i.bf16 %v1428_v1, %v1262_v42  ;;  %v1472_v23 = vsel %vm1132_vm3, %v1469_v38, %v1471_v53  ;;  %v1223_v63 = vsel %vm1214_vm2, %v1220_v24, %v1222_v28 }
 0x238   :  { %3074 = vrot.lane.b32.xlu0 %v3073_v62, %s3401_s1  ;;  %3089 = vrot.lane.b32.xlu2 %v3088_v33, %s3401_s1  ;;  %v1179_v35 = vpop.f32.mrf.mxu0  ;;  %v1385_v10 = vsel %vm1376_vm14, %v1382_v17, %v1384_v47  ;;  %v1268_v51 = vsel %vm1259_vm1, %v1265_v12, %v1267_v32  ;;  %v1430_v54 = vsel %vm1421_vm15, %v1427_v34, %v1429_v52  ;;  %v1224_v38 = vrot.slane %v4182_v21, 1 }
 0x239   :  { %3084 = vrot.lane.b32.xlu1 %v3083_v45, %s3400_s25  ;;  %v1180_v50 = vadd.f32 %v1179_v35, %v1155_v20  ;;  %v3108_v56 = vpack.i.bf16 %v1472_v23, %v1307_v40  ;;  %v3118_v3 = vpack.i.bf16 %v1223_v63, %v1385_v10  ;;  %v3123_v58 = vpack.i.bf16 %v1268_v51, %v1430_v54 }
 0x23a   :  { %v1431_v16 = vrot.slane %v4182_v21, 6  ;;  %v1225_v61 = vsel %vm1214_vm2, %v1222_v28, %v1224_v38  ;;  %v1313_v12 = vsel %vm1304_vm4, %v1310_v6, %v1312_v57  ;;  %v1474_v19 = vsel %vm1132_vm3, %v1471_v53, %v1473_v13  ;;  %v4200_v22 = vld [vmem:[#allocation2 + $0x30] sm:$0xff] }
 0x23b   :  { %1193 = vst.msk [vmem:[#allocation2 + $0x38] sm:$0xff] %vm1184_vm13, %v1180_v50  ;;  %v3113_v24 = vpack.i.bf16 %v1387_v26, %v1225_v61  ;;  %v3138_v30 = vpack.i.bf16 %v1313_v12, %v1474_v19  ;;  %v1314_v0 = vrot.slane %v4182_v21, 3  ;;  %v1475_v44 = vrot.slane %v4182_v21, 7 }
 0x23c   :  { %v1432_v11 = vsel %vm1421_vm15, %v1429_v52, %v1431_v16  ;;  %v1226_v62 = vrot.slane %v4200_v22, 1  ;;  %v1388_v33 = vrot.slane %v4200_v22, 5  ;;  %v1271_v45 = vrot.slane %v4200_v22, 2 }
 0x23d   :  { %v3128_v27 = vpack.i.bf16 %v1432_v11, %v1270_v5  ;;  %v1433_v20 = vrot.slane %v4200_v22, 6  ;;  %v1315_v6 = vsel %vm1304_vm4, %v1312_v57, %v1314_v0  ;;  %v1476_v17 = vsel %vm1132_vm3, %v1473_v13, %v1475_v44 }
 0x23e   :  { %v1227_v34 = vsel %vm1214_vm2, %v1224_v38, %v1226_v62  ;;  %v1389_v35 = vsel %vm1376_vm14, %v1386_v59, %v1388_v33  ;;  %v3133_v9 = vpack.i.bf16 %v1476_v17, %v1315_v6  ;;  %v1272_v15 = vsel %vm1259_vm1, %v1269_v14, %v1271_v45 }
 0x23f   :  { %v1434_v36 = vsel %vm1421_vm15, %v1431_v16, %v1433_v20  ;;  %v3143_v29 = vpack.i.bf16 %v1227_v34, %v1389_v35  ;;  %v1316_v4 = vrot.slane %v4200_v22, 3  ;;  %v1477_v1 = vrot.slane %v4200_v22, 7 }
 0x240   :  { %3099 = vrot.lane.b32.xlu0 %v3098_v7, %s3399_s3  ;;  %3094 = vrot.lane.b32.xlu2 %v3093_v41, %s3400_s25  ;;  %v1181_v55 = vpop.f32.mrf.mxu0  ;;  %v3148_v60 = vpack.i.bf16 %v1272_v15, %v1434_v36  ;;  %v3029_v15 = vld [vmem:[%s4619_s4 + $0x70] sm:$0xff]  ;;  %v3038_v36 = vld [vmem:[%s4619_s4 + $0xb8] sm:$0xff] }
 0x241   :  { %3104 = vrot.lane.b32.xlu1 %v3103_v43, %s3401_s1  ;;  %v1182_v48 = vadd.f32 %v1181_v55, %v1157_v49  ;;  %v1317_v42 = vsel %vm1304_vm4, %v1314_v0, %v1316_v4  ;;  %v1478_v49 = vsel %vm1132_vm3, %v1475_v44, %v1477_v1  ;;  %1976 = vmatpush.bf16.msra.mxu3 %v3038_v36 }
 0x242   :  { %v4217_v50 = vld [vmem:[#allocation2 + $0x38] sm:$0xff]  ;;  %v3153_v52 = vpack.i.bf16 %v1317_v42, %v1478_v49  ;;  %v3027_v42 = vld [vmem:[%s4619_s4 + $0x60] sm:$0xff] }
 0x243   :  { %1194 = vst.msk [vmem:[#allocation2 + $0x40] sm:$0xff] %vm1184_vm13, %v1182_v48  ;;  %v1228_v8 = vrot.slane %v4217_v50, 1  ;;  %v1390_v2 = vrot.slane %v4217_v50, 5  ;;  %v1273_v7 = vrot.slane %v4217_v50, 2  ;;  %v1435_v41 = vrot.slane %v4217_v50, 6 }
 0x244   :  { %v1318_v37 = vrot.slane %v4217_v50, 3  ;;  %v1479_v10 = vrot.slane %v4217_v50, 7 }
 0x245   :  { %v1229_v43 = vsel %vm1214_vm2, %v1226_v62, %v1228_v8  ;;  %v1391_v53 = vsel %vm1376_vm14, %v1388_v33, %v1390_v2  ;;  %v1274_v28 = vsel %vm1259_vm1, %v1271_v45, %v1273_v7  ;;  %v1436_v47 = vsel %vm1421_vm15, %v1433_v20, %v1435_v41 }
 0x246   :  { %v3158_v55 = vpack.i.bf16 %v1391_v53, %v1229_v43  ;;  %v3163_v48 = vpack.i.bf16 %v1436_v47, %v1274_v28  ;;  %v1319_v57 = vsel %vm1304_vm4, %v1316_v4, %v1318_v37  ;;  %v3046_v4 = vld [vmem:[%s4619_s4 + $0xf8] sm:$0xff]  ;;  %v3045_v53 = vld [vmem:[%s4619_s4 + $0xf0] sm:$0xff]  ;;  %v3036_v28 = vld [vmem:[%s4619_s4 + $0xa8] sm:$0xff] }
 0x247   :  { %2009 = vmatpush.bf16.msra.mxu0 %v3046_v4  ;;  %v3020_v47 = vld [vmem:[%s4619_s4 + $0x28] sm:$0xff] }
 0x248   :  { %3109 = vrot.lane.b32.xlu2 %v3108_v56, %s3399_s3  ;;  %3119 = vrot.lane.b32.xlu0 %v3118_v3, %s3400_s25  ;;  %v4252_v3 = vld [vmem:[#allocation2 + $0x48] sm:$0xff] }
 0x249   :  { %3124 = vrot.lane.b32.xlu1 %v3123_v58, %s3401_s1  ;;  %v1480_v58 = vsel %vm1132_vm3, %v1477_v1, %v1479_v10  ;;  %v1511_v14 = vrot.slane %v4252_v3, 1  ;;  %v1539_v26 = vrot.slane %v4252_v3, 5  ;;  %v1519_v12 = vrot.slane %v4252_v3, 2 }
 0x24a   :  { %v4234_v32 = vld [vmem:[#allocation2 + $0x40] sm:$0xff]  ;;  %v3168_v16 = vpack.i.bf16 %v1480_v58, %v1319_v57  ;;  %v1547_v19 = vrot.slane %v4252_v3, 6  ;;  %v1527_v17 = vrot.slane %v4252_v3, 3  ;;  %v1555_v34 = vrot.slane %v4252_v3, 7  ;;  %v3017_v57 = vld [vmem:[%s4619_s4 + $0x10] sm:$0xff] }
 0x24b   :  { %v4238_v23 = vrot.slane %v4234_v32, 1  ;;  %v1392_v63 = vrot.slane %v4234_v32, 5  ;;  %v4245_v51 = vrot.slane %v4234_v32, 2  ;;  %v1437_v54 = vrot.slane %v4234_v32, 6  ;;  %2010 = vmatpush.bf16.msra.mxu0 %v3045_v53  ;;  %v3023_v58 = vld [vmem:[%s4619_s4 + $0x40] sm:$0xff] }
 0x24c   :  { %v4262_v5 = vrot.slane %v4234_v32, 3  ;;  %v1481_v11 = vrot.slane %v4234_v32, 7 }
 0x24d   :  { %v1231_v40 = vsel %vm1214_vm2, %v1228_v8, %v4238_v23  ;;  %v1393_v56 = vsel %vm1376_vm14, %v1390_v2, %v1392_v63  ;;  %v1276_v38 = vsel %vm1259_vm1, %v1273_v7, %v4245_v51  ;;  %v1438_v59 = vsel %vm1421_vm15, %v1435_v41, %v1437_v54  ;;  %v3037_v7 = vld [vmem:[%s4619_s4 + $0xb0] sm:$0xff] }
 0x24e   :  { %v3173_v13 = vpack.i.bf16 %v1231_v40, %v1393_v56  ;;  %v3178_v61 = vpack.i.bf16 %v1276_v38, %v1438_v59  ;;  %v1321_v0 = vsel %vm1304_vm4, %v1318_v37, %v4262_v5  ;;  %v1482_v44 = vsel %vm1132_vm3, %v1479_v10, %v1481_v11  ;;  %v3021_v41 = vld [vmem:[%s4619_s4 + $0x30] sm:$0xff]  ;;  %1977 = vmatpush.bf16.msra.mxu3 %v3037_v7  ;;  %v3035_v37 = vld [vmem:[%s4619_s4 + $0xa0] sm:$0xff]  ;;  %v3034_v10 = vld [vmem:[%s4619_s4 + $0x98] sm:$0xff] }
 0x24f   :  { %v1520_v62 = vsel %vm1259_vm1, %v4245_v51, %v1519_v12  ;;  %v1548_v33 = vsel %vm1421_vm15, %v1437_v54, %v1547_v19  ;;  %v3183_v20 = vpack.i.bf16 %v1321_v0, %v1482_v44  ;;  %v1528_v35 = vsel %vm1304_vm4, %v4262_v5, %v1527_v17  ;;  %v3042_v40 = vld [vmem:[%s4619_s4 + $0xd8] sm:$0xff]  ;;  %v3033_v56 = vld [vmem:[%s4619_s4 + $0x90] sm:$0xff] }
 0x250   :  { %3114 = vrot.lane.b32.xlu2 %v3113_v24, %s3400_s25  ;;  %3139 = vrot.lane.b32.xlu0 %v3138_v30, %s3399_s3  ;;  %v3030_v24 = vld [vmem:[%s4619_s4 + $0x78] sm:$0xff]  ;;  %v1540_v30 = vsel %vm1376_vm14, %v1392_v63, %v1539_v26  ;;  %v3193_v6 = vpack.i.bf16 %v1548_v33, %v1520_v62  ;;  %v3203_v1 = vpack.i.bf16 %v1511_v14, %v1392_v63  ;;  %v3043_v63 = vld [vmem:[%s4619_s4 + $0xe0] sm:$0xff]  ;;  %v1353_v0 = vrot.slane %v4115_v25, 4 }
 0x251   :  { %3129 = vrot.lane.b32.xlu1 %v3128_v27, %s3401_s1  ;;  %v1512_v27 = vsel %vm1214_vm2, %v4238_v23, %v1511_v14  ;;  %1943 = vmatpush.bf16.msrb.mxu2 %v3030_v24  ;;  %v3208_v2 = vpack.i.bf16 %v1519_v12, %v1437_v54  ;;  %v3218_v49 = vpack.i.bf16 %v1539_v26, %v4238_v23  ;;  %v3025_v23 = vld [vmem:[%s4619_s4 + $0x50] sm:$0xff]  ;;  %v3024_v54 = vld [vmem:[%s4619_s4 + $0x48] sm:$0xff]  ;;  %v3015_v26 = vld [vmem:[%s4619_s4] sm:$0xff]  ;;  %vm2102_vm1 = vcmask 531456  }
 0x252   :  { %v3188_v45 = vpack.i.bf16 %v1540_v30, %v1512_v27  ;;  %v3213_v43 = vpack.i.bf16 %v1527_v17, %v1481_v11  ;;  %1978 = vmatpush.bf16.msra.mxu3 %v3036_v28  ;;  %v3041_v38 = vld [vmem:[%s4619_s4 + $0xd0] sm:$0xff]  ;;  %v3016_v14 = vld [vmem:[%s4619_s4 + $0x8] sm:$0xff]  ;;  %v1350_v27 = vrot.slane %v4107_v31, 4  ;;  %v1351_v30 = vrot.slane %v4109_v46, 4 }
 0x254   :  { %v1352_v33 = vsel %vm1349_vm5, %v1350_v27, %v1351_v30 }
 0x255   :  { %1944 = vmatpush.bf16.msrb.mxu2 %v3029_v15 }
 0x256   :  { %1979 = vmatpush.bf16.msra.mxu3 %v3035_v37 }
 0x258   :  { %3134 = vrot.lane.b32.xlu2 %v3133_v9, %s3399_s3  ;;  %3144 = vrot.lane.b32.xlu0 %v3143_v29, %s3400_s25  ;;  %v1556_v9 = vsel %vm1132_vm3, %v1481_v11, %v1555_v34  ;;  %v3022_v29 = vld [vmem:[%s4619_s4 + $0x38] sm:$0xff] }
 0x259   :  { %3149 = vrot.lane.b32.xlu1 %v3148_v60, %s3401_s1  ;;  %v3028_v60 = vld [vmem:[%s4619_s4 + $0x68] sm:$0xff]  ;;  %v3198_v8 = vpack.i.bf16 %v1556_v9, %v1528_v35  ;;  %1910 = vmatpush.bf16.msrb.mxu1 %v3022_v29 }
 0x25a   :  { %1945 = vmatpush.bf16.msrb.mxu2 %v3028_v60  ;;  %1980 = vmatpush.bf16.msra.mxu3 %v3034_v10 }
 0x25d   :  { %1911 = vmatpush.bf16.msrb.mxu1 %v3021_v41 }
 0x25e   :  { %1946 = vmatpush.bf16.msrb.mxu2 %v3027_v42  ;;  %1981 = vmatpush.bf16.msra.mxu3 %v3033_v56 }
 0x260   :  { %3154 = vrot.lane.b32.xlu0 %v3153_v52, %s3399_s3  ;;  %3159 = vrot.lane.b32.xlu2 %v3158_v55, %s3400_s25  ;;  %v3026_v52 = vld [vmem:[%s4619_s4 + $0x58] sm:$0xff]  ;;  %v3044_v55 = vld [vmem:[%s4619_s4 + $0xe8] sm:$0xff] }
 0x261   :  { %3164 = vrot.lane.b32.xlu1 %v3163_v48, %s3401_s1  ;;  %1912 = vmatpush.bf16.msrb.mxu1 %v3020_v47  ;;  %v3019_v48 = vld [vmem:[%s4619_s4 + $0x20] sm:$0xff] }
 0x262   :  { %1947 = vmatpush.bf16.msrb.mxu2 %v3026_v52  ;;  %2011 = vmatpush.bf16.msra.mxu0 %v3044_v55 }
 0x265   :  { %1913 = vmatpush.bf16.msrb.mxu1 %v3019_v48 }
 0x266   :  { %1948 = vmatpush.bf16.msrb.mxu2 %v3025_v23  ;;  %2012 = vmatpush.bf16.msra.mxu0 %v3043_v63 }
 0x268   :  { %3174 = vrot.lane.b32.xlu0 %v3173_v13, %s3400_s25  ;;  %3169 = vrot.lane.b32.xlu2 %v3168_v16, %s3399_s3  ;;  %v3032_v13 = vld [vmem:[%s4619_s4 + $0x88] sm:$0xff] }
 0x269   :  { %3179 = vrot.lane.b32.xlu1 %v3178_v61, %s3401_s1  ;;  %v3040_v16 = vld [vmem:[%s4619_s4 + $0xc8] sm:$0xff]  ;;  %1982 = vmatpush.bf16.msra.mxu3 %v3032_v13  ;;  %v3031_v61 = vld [vmem:[%s4619_s4 + $0x80] sm:$0xff] }
 0x26a   :  { %1949 = vmatpush.bf16.msrb.mxu2 %v3024_v54  ;;  %2013 = vmatpush.bf16.msra.mxu0 %v3042_v40 }
 0x26d   :  { %1983 = vmatpush.bf16.msra.mxu3 %v3031_v61 }
 0x26e   :  { %1950 = vmatpush.bf16.msrb.mxu2 %v3023_v58  ;;  %2014 = vmatpush.bf16.msra.mxu0 %v3041_v38 }
 0x270   :  { %3189 = vrot.lane.b32.xlu0 %v3188_v45, %s3400_s25  ;;  %3184 = vrot.lane.b32.xlu2 %v3183_v20, %s3399_s3  ;;  %v1354_v20 = vsel %vm1349_vm5, %v1351_v30, %v1353_v0  ;;  %v1359_v30 = vrot.slane %v4182_v21, 4 }
 0x271   :  { %3194 = vrot.lane.b32.xlu1 %v3193_v6, %s3401_s1 }
 0x272   :  { %2015 = vmatpush.bf16.msra.mxu0 %v3040_v16 }
 0x278   :  { %3204 = vrot.lane.b32.xlu0 %v3203_v1, %s3400_s25  ;;  %3199 = vrot.lane.b32.xlu2 %v3198_v8, %s3399_s3  ;;  %v1355_v8 = vrot.slane %v4133_v18, 4 }
 0x279   :  { %3209 = vrot.lane.b32.xlu1 %v3208_v2, %s3401_s1 }
 0x27a   :  { %v1356_v55 = vsel %vm1349_vm5, %v1353_v0, %v1355_v8 }
 0x280   :  { %3219 = vrot.lane.b32.xlu0 %v3218_v49, %s3400_s25  ;;  %3214 = vrot.lane.b32.xlu2 %v3213_v43, %s3399_s3 }
 0x281   :  { %1293 = vrot.lane.b32.xlu1 %v4245_v51, %s3401_s1  ;;  %v3018_v51 = vld [vmem:[%s4619_s4 + $0x18] sm:$0xff] }
 0x282   :  { %1914 = vmatpush.bf16.msrb.mxu1 %v3018_v51 }
 0x286   :  { %1915 = vmatpush.bf16.msrb.mxu1 %v3017_v57 }
 0x288   :  { %1551 = vrot.lane.b32.xlu0 %v1547_v19, %s3401_s1  ;;  %1338 = vrot.lane.b32.xlu2 %v4262_v5, %s3399_s3  ;;  %v3039_v5 = vld [vmem:[%s4619_s4 + $0xc0] sm:$0xff] }
 0x289   :  { %1559 = vrot.lane.b32.xlu1 %v1555_v34, %s3399_s3  ;;  %2016 = vmatpush.bf16.msra.mxu0 %v3039_v5 }
 0x28a   :  { %1916 = vmatpush.bf16.msrb.mxu1 %v3016_v14 }
 0x28e   :  { %1917 = vmatpush.bf16.msrb.mxu1 %v3015_v26 }
 0x292   :  { %v3090_v59 = vpop.permute.xlu2 %3089 }
 0x293   :  { %v3092_v47 = vunpack.i.h.bf16 %v3090_v59  ;;  %v3091_v52 = vunpack.i.l.bf16 %v3090_v59 }
 0x29a   :  { %v3095_v11 = vpop.permute.xlu2 %3094 }
 0x29b   :  { %v3097_v2 = vunpack.i.h.bf16 %v3095_v11  ;;  %v3096_v7 = vunpack.i.l.bf16 %v3095_v11 }
 0x29d   :  { %v1593_v48 = vsel %vm1184_vm13, %v1356_v55, %v3097_v2  ;;  %v1563_v23 = vsel %vm1184_vm13, %v4107_v31, %v3096_v7 }
 0x2a2   :  { %v3080_v12 = vpop.permute.xlu1 %3079  ;;  %v3070_v19 = vpop.permute.xlu0 %3069 }
 0x2a3   :  { %v3110_v24 = vpop.permute.xlu2 %3109  ;;  %v3072_v44 = vunpack.i.h.bf16 %v3070_v19  ;;  %v3071_v62 = vunpack.i.l.bf16 %v3070_v19  ;;  %v3082_v35 = vunpack.i.h.bf16 %v3080_v12  ;;  %v3081_v9 = vunpack.i.l.bf16 %v3080_v12 }
 0x2a4   :  { %v3112_v56 = vunpack.i.h.bf16 %v3110_v24  ;;  %v3111_v57 = vunpack.i.l.bf16 %v3110_v24  ;;  %v1357_v19 = vrot.slane %v4159_v39, 4 }
 0x2a5   :  { %v1591_v15 = vsel %vm1184_vm13, %v1352_v33, %v3071_v62  ;;  %v1592_v36 = vsel %vm1184_vm13, %v1354_v20, %v3072_v44 }
 0x2a6   :  { %v1358_v0 = vsel %vm1349_vm5, %v1355_v8, %v1357_v19 }
 0x2aa   :  { %v3075_v45 = vpop.permute.xlu0 %3074 }
 0x2ab   :  { %v3077_v6 = vunpack.i.h.bf16 %v3075_v45  ;;  %v3076_v17 = vunpack.i.l.bf16 %v3075_v45  ;;  %v3085_v34 = vpop.permute.xlu1 %3084  ;;  %v4409_v41 = vpop.permute.xlu2 %3114 }
 0x2ac   :  { %v3087_v60 = vunpack.i.h.bf16 %v3085_v34  ;;  %v3086_v1 = vunpack.i.l.bf16 %v3085_v34  ;;  %v3117_v33 = vunpack.i.h.bf16 %v4409_v41  ;;  %v3116_v45 = vunpack.i.l.bf16 %v4409_v41 }
 0x2ad   :  { %v1600_v29 = vsel %vm594_vm0, %v1591_v15, %v3076_v17  ;;  %v1601_v4 = vsel %vm594_vm0, %v1592_v36, %v3077_v6  ;;  %v1360_v17 = vsel %vm1349_vm5, %v1357_v19, %v1359_v30 }
 0x2ae   :  { %v1609_v42 = vsel %vm1581_vm6, %v1600_v29, %v3081_v9  ;;  %v1610_v49 = vsel %vm1581_vm6, %v1601_v4, %v3082_v35  ;;  %v1565_v53 = vsel %vm1184_vm13, %v4115_v25, %v3087_v60  ;;  %v1564_v28 = vsel %vm1184_vm13, %v4109_v46, %v3086_v1 }
 0x2af   :  { %v1631_v43 = vpack.c.bf16 %v1610_v49, %v1609_v42  ;;  %v1573_v54 = vsel %vm594_vm0, %v1564_v28, %v3091_v52  ;;  %v1574_v25 = vsel %vm594_vm0, %v1565_v53, %v3092_v47  ;;  %v1595_v7 = vsel %vm1184_vm13, %v1360_v17, %v3117_v33 }
 0x2b1   :  { %1951 = vmatmul.bf16.vlgmr.msrb.gmra.mxu2 %v1631_v43 }
 0x2b2   :  { %v3100_v37 = vpop.permute.xlu0 %3099 }
 0x2b3   :  { %v3102_v63 = vunpack.i.h.bf16 %v3100_v37  ;;  %v3101_v10 = vunpack.i.l.bf16 %v3100_v37  ;;  %v3105_v51 = vpop.permute.xlu1 %3104  ;;  %v3135_v5 = vpop.permute.xlu2 %3134 }
 0x2b4   :  { %v3107_v40 = vunpack.i.h.bf16 %v3105_v51  ;;  %v3106_v46 = vunpack.i.l.bf16 %v3105_v51  ;;  %v3137_v35 = vunpack.i.h.bf16 %v3135_v5  ;;  %v3136_v9 = vunpack.i.l.bf16 %v3135_v5 }
 0x2b5   :  { %v1583_v58 = vsel %vm1581_vm6, %v1573_v54, %v3101_v10  ;;  %v1584_v38 = vsel %vm1581_vm6, %v1574_v25, %v3102_v63  ;;  %v1363_v54 = vrot.slane %v4217_v50, 4 }
 0x2b6   :  { %v1632_v59 = vpack.c.bf16 %v1584_v38, %v1583_v58  ;;  %v1602_v13 = vsel %vm594_vm0, %v1593_v48, %v3107_v40  ;;  %v1572_v31 = vsel %vm594_vm0, %v1563_v23, %v3106_v46  ;;  %v1361_v23 = vrot.slane %v4200_v22, 4 }
 0x2b7   :  { %v1611_v14 = vsel %vm1581_vm6, %v1602_v13, %v3112_v56  ;;  %v1582_v16 = vsel %vm1581_vm6, %v1572_v31, %v3111_v57 }
 0x2b8   :  { %v1633_v61 = vpack.c.bf16 %v1611_v14, %v1610_v49  ;;  %1984 = vmatmul.bf16.vlgmr.msra.gmra.mxu3 %v1632_v59  ;;  %v1630_v26 = vpack.c.bf16 %v1583_v58, %v1582_v16  ;;  %v1362_v57 = vsel %vm1349_vm5, %v1359_v30, %v1361_v23  ;;  %v1364_v59 = vsel %vm1349_vm5, %v1361_v23, %v1363_v54 }
 0x2ba   :  { %1918 = vmatmul.bf16.vlgmr.msrb.gmra.mxu1 %v1630_v26  ;;  %2017 = vmatmul.bf16.vlgmr.msra.gmra.mxu0 %v1633_v61  ;;  %v3120_v11 = vpop.permute.xlu0 %3119 }
 0x2bb   :  { %v3125_v12 = vpop.permute.xlu1 %3124  ;;  %v3122_v24 = vunpack.i.h.bf16 %v3120_v11  ;;  %v3121_v27 = vunpack.i.l.bf16 %v3120_v11  ;;  %v3160_v15 = vpop.permute.xlu2 %3159 }
 0x2bc   :  { %v3127_v44 = vunpack.i.h.bf16 %v3125_v12  ;;  %v3126_v62 = vunpack.i.l.bf16 %v3125_v12  ;;  %v3162_v25 = vunpack.i.h.bf16 %v3160_v15  ;;  %v3161_v40 = vunpack.i.l.bf16 %v3160_v15 }
 0x2bd   :  { %v1566_v20 = vsel %vm1184_vm13, %v4133_v18, %v3122_v24  ;;  %v1594_v6 = vsel %vm1184_vm13, %v1358_v0, %v3121_v27  ;;  %v1567_v18 = vsel %vm1184_vm13, %v4159_v39, %v3116_v45 }
 0x2be   :  { %v1575_v60 = vsel %vm594_vm0, %v1566_v20, %v3127_v44  ;;  %v1603_v1 = vsel %vm594_vm0, %v1594_v6, %v3126_v62  ;;  %v1597_v31 = vsel %vm1184_vm13, %v1364_v59, %v3162_v25 }
 0x2c2   :  { %v3140_v34 = vpop.permute.xlu0 %3139 }
 0x2c3   :  { %v3142_v36 = vunpack.i.h.bf16 %v3140_v34  ;;  %v3141_v29 = vunpack.i.l.bf16 %v3140_v34  ;;  %v3130_v4 = vpop.permute.xlu1 %3129  ;;  %v3170_v51 = vpop.permute.xlu2 %3169  ;;  %v1365_v34 = vrot.slane %v4234_v32, 4 }
 0x2c4   :  { %v3132_v8 = vunpack.i.h.bf16 %v3130_v4  ;;  %v3131_v2 = vunpack.i.l.bf16 %v3130_v4  ;;  %v3171_v24 = vunpack.i.l.bf16 %v3170_v51 }
 0x2c5   :  { %v1612_v41 = vsel %vm1581_vm6, %v1603_v1, %v3141_v29  ;;  %v1585_v42 = vsel %vm1581_vm6, %v1575_v60, %v3142_v36  ;;  %v1366_v29 = vsel %vm1349_vm5, %v1363_v54, %v1365_v34 }
 0x2c6   :  { %v1604_v49 = vsel %vm594_vm0, %v1595_v7, %v3132_v8  ;;  %v1576_v43 = vsel %vm594_vm0, %v1567_v18, %v3131_v2  ;;  %v1635_v53 = vpack.c.bf16 %v1612_v41, %v1611_v14  ;;  %v1634_v28 = vpack.c.bf16 %v1585_v42, %v1584_v38 }
 0x2c7   :  { %v1586_v47 = vsel %vm1581_vm6, %v1576_v43, %v3136_v9  ;;  %v1613_v52 = vsel %vm1581_vm6, %v1604_v49, %v3137_v35  ;;  %v1569_v14 = vsel %vm1184_vm13, %v4200_v22, %v3161_v40  ;;  %v1535_v7 = vrot.slane %v4252_v3, 4 }
 0x2c8   :  { %1956 = vmatmul.bf16.gmra.mxu2 %v1635_v53  ;;  %v1636_v55 = vpack.c.bf16 %v1586_v47, %v1585_v42  ;;  %v1637_v37 = vpack.c.bf16 %v1613_v52, %v1612_v41 }
 0x2ca   :  { %1923 = vmatmul.bf16.gmra.mxu1 %v1634_v28  ;;  %1989 = vmatmul.bf16.gmra.mxu3 %v1636_v55  ;;  %v3145_v39 = vpop.permute.xlu0 %3144  ;;  %v1536_v55 = vsel %vm1349_vm5, %v1365_v34, %v1535_v7 }
 0x2cb   :  { %2022 = vmatmul.bf16.gmra.mxu0 %v1637_v37  ;;  %v3150_v48 = vpop.permute.xlu1 %3149  ;;  %v3147_v63 = vunpack.i.h.bf16 %v3145_v39  ;;  %v3146_v10 = vunpack.i.l.bf16 %v3145_v39  ;;  %v3185_v20 = vpop.permute.xlu2 %3184 }
 0x2cc   :  { %v3152_v46 = vunpack.i.h.bf16 %v3150_v48  ;;  %v3151_v56 = vunpack.i.l.bf16 %v3150_v48  ;;  %v3186_v18 = vunpack.i.l.bf16 %v3185_v20  ;;  %v3187_v43 = vunpack.i.h.bf16 %v3185_v20 }
 0x2cd   :  { %v1568_v58 = vsel %vm1184_vm13, %v4182_v21, %v3147_v63  ;;  %v1596_v38 = vsel %vm1184_vm13, %v1362_v57, %v3146_v10  ;;  %v3172_v21 = vunpack.i.h.bf16 %v3170_v51 }
 0x2ce   :  { %v1605_v12 = vsel %vm594_vm0, %v1596_v38, %v3151_v56  ;;  %v1577_v19 = vsel %vm594_vm0, %v1568_v58, %v3152_v46 }
 0x2d2   :  { %v3155_v13 = vpop.permute.xlu0 %3154 }
 0x2d3   :  { %v3157_v16 = vunpack.i.h.bf16 %v3155_v13  ;;  %v3156_v61 = vunpack.i.l.bf16 %v3155_v13  ;;  %v3165_v26 = vpop.permute.xlu1 %3164  ;;  %v3200_v41 = vpop.permute.xlu2 %3199 }
 0x2d4   :  { %v3167_v5 = vunpack.i.h.bf16 %v3165_v26  ;;  %v3166_v11 = vunpack.i.l.bf16 %v3165_v26  ;;  %v3201_v63 = vunpack.i.l.bf16 %v3200_v41 }
 0x2d5   :  { %v1614_v27 = vsel %vm1581_vm6, %v1605_v12, %v3156_v61  ;;  %v1587_v30 = vsel %vm1581_vm6, %v1577_v19, %v3157_v16 }
 0x2d6   :  { %v1578_v0 = vsel %vm594_vm0, %v1569_v14, %v3166_v11  ;;  %v1606_v44 = vsel %vm594_vm0, %v1597_v31, %v3167_v5  ;;  %v1639_v22 = vpack.c.bf16 %v1614_v27, %v1613_v52  ;;  %v1638_v62 = vpack.c.bf16 %v1587_v30, %v1586_v47 }
 0x2d7   :  { %v1588_v33 = vsel %vm1581_vm6, %v1578_v0, %v3171_v24  ;;  %v1615_v45 = vsel %vm1581_vm6, %v1606_v44, %v3172_v21 }
 0x2d8   :  { %1961 = vmatmul.bf16.gmra.mxu2 %v1639_v22  ;;  %v1640_v6 = vpack.c.bf16 %v1588_v33, %v1587_v30  ;;  %v1641_v17 = vpack.c.bf16 %v1615_v45, %v1614_v27 }
 0x2da   :  { %1928 = vmatmul.bf16.gmra.mxu1 %v1638_v62  ;;  %1994 = vmatmul.bf16.gmra.mxu3 %v1640_v6  ;;  %v3175_v35 = vpop.permute.xlu0 %3174 }
 0x2db   :  { %2027 = vmatmul.bf16.gmra.mxu0 %v1641_v17  ;;  %v3177_v9 = vunpack.i.h.bf16 %v3175_v35  ;;  %v3176_v15 = vunpack.i.l.bf16 %v3175_v35  ;;  %v3180_v36 = vpop.permute.xlu1 %3179  ;;  %v3215_v16 = vpop.permute.xlu2 %3214 }
 0x2dc   :  { %v3181_v4 = vunpack.i.l.bf16 %v3180_v36  ;;  %v3182_v1 = vunpack.i.h.bf16 %v3180_v36  ;;  %v3216_v12 = vunpack.i.l.bf16 %v3215_v16  ;;  %v3217_v24 = vunpack.i.h.bf16 %v3215_v16 }
 0x2dd   :  { %v1598_v60 = vsel %vm1184_vm13, %v1366_v29, %v3176_v15  ;;  %v1570_v8 = vsel %vm1184_vm13, %v4217_v50, %v3177_v9  ;;  %v3202_v50 = vunpack.i.h.bf16 %v3200_v41  ;;  %v4499_v29 = vld [vmem:[#allocation6] ss:$0 sm:$0xff] }
 0x2de   :  { %v1607_v2 = vsel %vm594_vm0, %v1598_v60, %v3181_v4  ;;  %v1579_v42 = vsel %vm594_vm0, %v1570_v8, %v3182_v1 }
 0x2df   :  { %v1616_v52 = vsel %vm1581_vm6, %v1607_v2, %v3186_v18  ;;  %v1589_v10 = vsel %vm1581_vm6, %v1579_v42, %v3187_v43 }
 0x2e0   :  { %v1643_v25 = vpack.c.bf16 %v1616_v52, %v1615_v45  ;;  %v1642_v56 = vpack.c.bf16 %v1589_v10, %v1588_v33 }
 0x2e2   :  { %v3190_v49 = vpop.permute.xlu0 %3189 }
 0x2e3   :  { %v3192_v53 = vunpack.i.h.bf16 %v3190_v49  ;;  %v3191_v28 = vunpack.i.l.bf16 %v3190_v49  ;;  %v3195_v47 = vpop.permute.xlu1 %3194 }
 0x2e4   :  { %v3197_v37 = vunpack.i.h.bf16 %v3195_v47  ;;  %v3196_v39 = vunpack.i.l.bf16 %v3195_v47 }
 0x2e5   :  { %v1624_v48 = vsel %vm1184_vm13, %v1536_v55, %v3192_v53  ;;  %v1618_v23 = vsel %vm1184_vm13, %v4234_v32, %v3191_v28 }
 0x2e6   :  { %v1620_v51 = vsel %vm594_vm0, %v1618_v23, %v3196_v39  ;;  %v1626_v54 = vsel %vm594_vm0, %v1624_v48, %v3197_v37 }
 0x2e7   :  { %v1622_v40 = vsel %vm1581_vm6, %v1620_v51, %v3201_v63  ;;  %v1628_v46 = vsel %vm1581_vm6, %v1626_v54, %v3202_v50 }
 0x2e8   :  { %1966 = vmatmul.bf16.gmra.mxu2 %v1643_v25  ;;  %v1644_v57 = vpack.c.bf16 %v1622_v40, %v1589_v10  ;;  %v1645_v58 = vpack.c.bf16 %v1628_v46, %v1616_v52 }
 0x2ea   :  { %1933 = vmatmul.bf16.gmra.mxu1 %v1642_v56  ;;  %v3205_v38 = vpop.permute.xlu0 %3204  ;;  %1999 = vmatmul.bf16.gmra.mxu3 %v1644_v57 }
 0x2eb   :  { %v3207_v59 = vunpack.i.h.bf16 %v3205_v38  ;;  %v3206_v13 = vunpack.i.l.bf16 %v3205_v38  ;;  %2032 = vmatmul.bf16.gmra.mxu0 %v1645_v58  ;;  %v3210_v31 = vpop.permute.xlu1 %3209 }
 0x2ec   :  { %v3211_v14 = vunpack.i.l.bf16 %v3210_v31  ;;  %v3212_v26 = vunpack.i.h.bf16 %v3210_v31 }
 0x2ed   :  { %v1599_v61 = vsel %vm1184_vm13, %v1365_v34, %v3206_v13  ;;  %v1619_v5 = vsel %vm1184_vm13, %v4252_v3, %v3207_v59  ;;  %v1339_v3 = vpop.permute.xlu2 %1338 }
 0x2ee   :  { %v1608_v11 = vsel %vm594_vm0, %v1599_v61, %v3211_v14  ;;  %v1621_v19 = vsel %vm594_vm0, %v1619_v5, %v3212_v26 }
 0x2ef   :  { %v1617_v0 = vsel %vm1581_vm6, %v1608_v11, %v3216_v12  ;;  %v1623_v22 = vsel %vm1581_vm6, %v1621_v19, %v3217_v24 }
 0x2f0   :  { %v1647_v45 = vpack.c.bf16 %v1617_v0, %v1617_v0  ;;  %v1648_v17 = vpack.c.bf16 %v1623_v22, %v1623_v22 }
 0x2f2   :  { %v3220_v21 = vpop.permute.xlu0 %3219 }
 0x2f3   :  { %v3221_v27 = vunpack.i.l.bf16 %v3220_v21  ;;  %v1294_v30 = vpop.permute.xlu1 %1293  ;;  %v3222_v62 = vunpack.i.h.bf16 %v3220_v21 }
 0x2f5   :  { %v1571_v44 = vsel %vm1184_vm13, %v4234_v32, %v3221_v27  ;;  %v1625_v35 = vsel %vm1184_vm13, %v1535_v7, %v3222_v62 }
 0x2f6   :  { %v1580_v33 = vsel %vm594_vm0, %v1571_v44, %v1294_v30 }
 0x2f7   :  { %v1590_v20 = vsel %vm1581_vm6, %v1580_v33, %v1339_v3 }
 0x2f8   :  { %v1646_v6 = vpack.c.bf16 %v1590_v20, %v1590_v20  ;;  %1971 = vmatmul.bf16.gmra.mxu2 %v1647_v45 }
 0x2fa   :  { %1938 = vmatmul.bf16.gmra.mxu1 %v1646_v6  ;;  %2004 = vmatmul.bf16.gmra.mxu3 %v1648_v17  ;;  %v1552_v34 = vpop.permute.xlu0 %1551 }
 0x2fb   :  { %v1627_v9 = vsel %vm594_vm0, %v1625_v35, %v1552_v34  ;;  %v1560_v32 = vpop.permute.xlu1 %1559 }
 0x2fc   :  { %v1629_v15 = vsel %vm1581_vm6, %v1627_v9, %v1560_v32 }
 0x2fd   :  { %v1649_v36 = vpack.c.bf16 %v1629_v15, %v1629_v15 }
 0x2ff   :  { %2037 = vmatmul.bf16.gmra.mxu0 %v1649_v36 }
 0x334   :  { %v1952_v4 = vpop.f32.mrf.mxu2 }
 0x337   :  { %v1919_v60 = vpop.f32.mrf.mxu1  ;;  %v2018_v1 = vpop.f32.mrf.mxu0 }
 0x338   :  { %v1920_v8 = vadd.f32 %v4499_v29, %v1919_v60 }
 0x33a   :  { %v1953_v2 = vadd.f32 %v1952_v4, %v1920_v8 }
 0x33b   :  { %v1985_v18 = vpop.f32.mrf.mxu3 }
 0x33c   :  { %v1986_v41 = vadd.f32 %v1985_v18, %v1953_v2  ;;  %v1954_v28 = vpop.f32.mrf.mxu2 }
 0x33e   :  { %v2019_v42 = vadd.f32 %v2018_v1, %v1986_v41 }
 0x33f   :  { %v1921_v49 = vpop.f32.mrf.mxu1  ;;  %v2020_v7 = vpop.f32.mrf.mxu0 }
 0x340   :  { %v2051_v43 = vmin.f32 %v2019_v42, 0.0  ;;  %v1922_v53 = vadd.f32 %v4499_v29, %v1921_v49  ;;  %vm2042_vm7 = vcmp.gt.f32.partialorder %v2019_v42, 0.0 }
 0x342   :  { %v1955_v47 = vadd.f32 %v1954_v28, %v1922_v53  ;;  %v2060_v55 = vmul.f32 1.442695, %v2051_v43 }
 0x343   :  { %v1987_v52 = vpop.f32.mrf.mxu3 }
 0x344   :  { %v1988_v37 = vadd.f32 %v1987_v52, %v1955_v47  ;;  %3275 = vpow2.f32 %v2060_v55 }
 0x346   :  { %v2021_v39 = vadd.f32 %v2020_v7, %v1988_v37 }
 0x347   :  { %v1924_v50 = vpop.f32.mrf.mxu1 }
 0x348   :  { %v2052_v48 = vmin.f32 %v2021_v39, 0.0  ;;  %v2023_v23 = vpop.f32.mrf.mxu0  ;;  %v1925_v10 = vadd.f32 %v4499_v29, %v1924_v50  ;;  %vm2043_vm8 = vcmp.gt.f32.partialorder %v2021_v39, 0.0 }
 0x34a   :  { %v2062_v63 = vmul.f32 1.442695, %v2052_v48  ;;  %v3276_v40 = vpop.eup %3275 }
 0x34b   :  { %v1957_v51 = vpop.f32.mrf.mxu2  ;;  %v2853_v38 = vadd.f32 -1.0, %v3276_v40 }
 0x34c   :  { %3277 = vpow2.f32 %v2062_v63  ;;  %v1958_v54 = vadd.f32 %v1957_v51, %v1925_v10 }
 0x34d   :  { %v1990_v25 = vpop.f32.mrf.mxu3  ;;  %v4506_v16 = vsel %vm2042_vm7, %v2019_v42, %v2853_v38 }
 0x34e   :  { %v1991_v46 = vadd.f32 %v1990_v25, %v1958_v54 }
 0x34f   :  { %v1926_v56 = vpop.f32.mrf.mxu1 }
 0x350   :  { %v4504_v57 = vadd.f32 %v2023_v23, %v1991_v46  ;;  %v2025_v58 = vpop.f32.mrf.mxu0  ;;  %v1927_v60 = vadd.f32 %v4499_v29, %v1926_v56 }
 0x352   :  { %v3278_v59 = vpop.eup %3277  ;;  %vm2044_vm15 = vcmp.gt.f32.partialorder %v4504_v57, 0.0 }
 0x353   :  { %v1959_v13 = vpop.f32.mrf.mxu2  ;;  %v2854_v31 = vadd.f32 -1.0, %v3278_v59 }
 0x354   :  { %v1960_v18 = vadd.f32 %v1959_v13, %v1927_v60 }
 0x355   :  { %v1992_v14 = vpop.f32.mrf.mxu3  ;;  %v4508_v61 = vsel %vm2043_vm8, %v2021_v39, %v2854_v31 }
 0x356   :  { %v2097_v26 = vpack.c.bf16 %v4508_v61, %v4506_v16  ;;  %v1993_v55 = vadd.f32 %v1992_v14, %v1960_v18  ;;  %v4541_v14 = vld [vmem:[%s4622_s7 + $0x58] sm:$0xff]  ;;  %v3052_v16 = vld [vmem:[%s4622_s7 + $0x28] sm:$0xff]  ;;  %v3047_v61 = vld [vmem:[%s4622_s7] sm:$0xff] }
 0x357   :  { %v1929_v5 = vpop.f32.mrf.mxu1  ;;  %2323 = vmatpush.bf16.msrb.mxu3 %v4541_v14 }
 0x358   :  { %v2028_v11 = vpop.f32.mrf.mxu0  ;;  %v1930_v32 = vadd.f32 %v4499_v29, %v1929_v5  ;;  %v4528_v10 = vadd.f32 %v2025_v58, %v1993_v55  ;;  %v4536_v58 = vld [vmem:[%s4622_s7 + $0x18] sm:$0xff]  ;;  %v2053_v5 = vmin.f32 %v4504_v57, 0.0 }
 0x359   :  { %2165 = vmatpush.bf16.msra.mxu2 %v4536_v58 }
 0x35a   :  { %v2054_v13 = vmin.f32 %v4528_v10, 0.0  ;;  %vm2045_vm14 = vcmp.gt.f32.partialorder %v4528_v10, 0.0 }
 0x35b   :  { %v1962_v12 = vpop.f32.mrf.mxu2 }
 0x35c   :  { %v1963_v1 = vadd.f32 %v1962_v12, %v1930_v32  ;;  %v4548_v12 = vld [vmem:[%s4622_s7 + $0x10] sm:$0xff] }
 0x35d   :  { %v1995_v19 = vpop.f32.mrf.mxu3  ;;  %2166 = vmatpush.bf16.msra.mxu2 %v4548_v12 }
 0x35e   :  { %v1996_v7 = vadd.f32 %v1995_v19, %v1963_v1  ;;  %v2066_v19 = vmul.f32 1.442695, %v2054_v13 }
 0x35f   :  { %v1931_v21 = vpop.f32.mrf.mxu1 }
 0x360   :  { %v2030_v24 = vpop.f32.mrf.mxu0  ;;  %v1932_v6 = vadd.f32 %v4499_v29, %v1931_v21  ;;  %v4525_v48 = vadd.f32 %v2028_v11, %v1996_v7 }
 0x362   :  { %v2055_v40 = vmin.f32 %v4525_v48, 0.0  ;;  %vm2046_vm13 = vcmp.gt.f32.partialorder %v4525_v48, 0.0 }
 0x363   :  { %v1964_v27 = vpop.f32.mrf.mxu2 }
 0x364   :  { %v1965_v15 = vadd.f32 %v1964_v27, %v1932_v6  ;;  %v2068_v11 = vmul.f32 1.442695, %v2055_v40  ;;  %v2064_v27 = vmul.f32 1.442695, %v2053_v5 }
 0x365   :  { %v1997_v30 = vpop.f32.mrf.mxu3 }
 0x366   :  { %v1998_v41 = vadd.f32 %v1997_v30, %v1965_v15 }
 0x367   :  { %v1934_v0 = vpop.f32.mrf.mxu1 }
 0x368   :  { %v2033_v44 = vpop.f32.mrf.mxu0  ;;  %v1935_v3 = vadd.f32 %v4499_v29, %v1934_v0  ;;  %v4523_v37 = vadd.f32 %v2030_v24, %v1998_v41  ;;  %v4555_v0 = vld [vmem:[%s4622_s7 + $0x8] sm:$0xff] }
 0x369   :  { %2167 = vmatpush.bf16.msra.mxu2 %v4555_v0 }
 0x36a   :  { %v2056_v51 = vmin.f32 %v4523_v37, 0.0  ;;  %vm2047_vm12 = vcmp.gt.f32.partialorder %v4523_v37, 0.0 }
 0x36b   :  { %v1967_v22 = vpop.f32.mrf.mxu2 }
 0x36c   :  { %v1968_v17 = vadd.f32 %v1967_v22, %v1935_v3  ;;  %v2070_v31 = vmul.f32 1.442695, %v2056_v51 }
 0x36d   :  { %v2000_v62 = vpop.f32.mrf.mxu3  ;;  %2168 = vmatpush.bf16.msra.mxu2 %v3047_v61 }
 0x36e   :  { %v2001_v8 = vadd.f32 %v2000_v62, %v1968_v17  ;;  %v3402_v62 = vmov 0  }
 0x36f   :  { %v1936_v33 = vpop.f32.mrf.mxu1 }
 0x370   :  { %v1937_v45 = vadd.f32 %v4499_v29, %v1936_v33  ;;  %v2035_v34 = vpop.f32.mrf.mxu0  ;;  %v4520_v43 = vadd.f32 %v2033_v44, %v2001_v8  ;;  %v2107_v33 = vsel %vm1132_vm3, 65535, %v3402_v62 }
 0x371   :  { %2269 = vmatpush.bf16.msrb.mxu2 %v4541_v14 }
 0x372   :  { %v2057_v23 = vmin.f32 %v4520_v43, 0.0  ;;  %vm2048_vm11 = vcmp.gt.f32.partialorder %v4520_v43, 0.0 }
 0x373   :  { %v1969_v20 = vpop.f32.mrf.mxu2 }
 0x374   :  { %v1970_v35 = vadd.f32 %v1969_v20, %v1937_v45  ;;  %v2072_v46 = vmul.f32 1.442695, %v2057_v23 }
 0x375   :  { %v2002_v9 = vpop.f32.mrf.mxu3 }
 0x376   :  { %v2003_v36 = vadd.f32 %v2002_v9, %v1970_v35 }
 0x377   :  { %v1939_v4 = vpop.f32.mrf.mxu1 }
 0x378   :  { %v4517_v2 = vadd.f32 %v2035_v34, %v2003_v36  ;;  %v1940_v42 = vadd.f32 %v4499_v29, %v1939_v4 }
 0x37a   :  { %v2058_v47 = vmin.f32 %v4517_v2, 0.0  ;;  %vm2049_vm10 = vcmp.gt.f32.partialorder %v4517_v2, 0.0 }
 0x37b   :  { %v1972_v49 = vpop.f32.mrf.mxu2 }
 0x37c   :  { %v1973_v53 = vadd.f32 %v1972_v49, %v1940_v42  ;;  %v2038_v28 = vpop.f32.mrf.mxu0  ;;  %v2074_v29 = vmul.f32 1.442695, %v2058_v47  ;;  %v3051_v47 = vld [vmem:[%s4622_s7 + $0x20] sm:$0xff] }
 0x37d   :  { %v2005_v52 = vpop.f32.mrf.mxu3 }
 0x37e   :  { %v2006_v39 = vadd.f32 %v2005_v52, %v1973_v53  ;;  %3279 = vpow2.f32 %v2074_v29  ;;  %v3054_v53 = vld [vmem:[%s4622_s7 + $0x38] sm:$0xff]  ;;  %v3055_v52 = vld [vmem:[%s4622_s7 + $0x40] sm:$0xff] }
 0x37f   :  { %v1941_v50 = vpop.f32.mrf.mxu1 }
 0x380   :  { %v2039_v63 = vadd.f32 %v2038_v28, %v2006_v39  ;;  %v3053_v28 = vld [vmem:[%s4622_s7 + $0x30] sm:$0xff] }
 0x382   :  { %v2059_v54 = vmin.f32 %v2039_v63, 0.0  ;;  %vm2050_vm9 = vcmp.gt.f32.partialorder %v2039_v63, 0.0 }
 0x383   :  { %v1974_v25 = vpop.f32.mrf.mxu2 }
 0x384   :  { %v2076_v56 = vmul.f32 1.442695, %v2059_v54  ;;  %v2040_v38 = vpop.f32.mrf.mxu0  ;;  %v3280_v21 = vpop.eup %3279 }
 0x385   :  { %v2007_v59 = vpop.f32.mrf.mxu3  ;;  %v2860_v3 = vadd.f32 -1.0, %v3280_v21 }
 0x386   :  { %3281 = vpow2.f32 %v2076_v56 }
 0x387   :  { %3283 = vpow2.f32 %v2072_v46  ;;  %v2094_v35 = vsel %vm2049_vm10, %v4517_v2, %v2860_v3 }
 0x388   :  { %3285 = vpow2.f32 %v2070_v31  ;;  %v2124_v31 = vld [vmem:[%s4623_s8] sm:$0x1] }
 0x389   :  { %3287 = vpow2.f32 %v2068_v11 }
 0x38a   :  { %3289 = vpow2.f32 %v2066_v19 }
 0x38b   :  { %3291 = vpow2.f32 %v2064_v27 }
 0x38c   :  { %v3282_v24 = vpop.eup %3281 }
 0x38d   :  { %v2861_v30 = vadd.f32 -1.0, %v3282_v24  ;;  %v3284_v44 = vpop.eup %3283 }
 0x38e   :  { %v3286_v45 = vpop.eup %3285  ;;  %v2859_v6 = vadd.f32 -1.0, %v3284_v44 }
 0x38f   :  { %v2095_v22 = vsel %vm2050_vm9, %v2039_v63, %v2861_v30  ;;  %v3288_v17 = vpop.eup %3287  ;;  %v2858_v9 = vadd.f32 -1.0, %v3286_v45 }
 0x390   :  { %v2101_v20 = vpack.c.bf16 %v2095_v22, %v2095_v22  ;;  %v3290_v32 = vpop.eup %3289  ;;  %v2093_v15 = vsel %vm2048_vm11, %v4520_v43, %v2859_v6  ;;  %v2857_v36 = vadd.f32 -1.0, %v3288_v17  ;;  %v2096_v43 = vld [vmem:[#allocation8] sm:$0x7] }
 0x391   :  { %v3292_v4 = vpop.eup %3291  ;;  %v2100_v60 = vpack.c.bf16 %v2094_v35, %v2093_v15  ;;  %v2092_v1 = vsel %vm2047_vm12, %v4523_v37, %v2858_v9  ;;  %v2856_v8 = vadd.f32 -1.0, %v3290_v32 }
 0x392   :  { %v2109_v34 = vand.u32 %v2107_v33, %v2101_v20  ;;  %v2091_v2 = vsel %vm2046_vm13, %v4525_v48, %v2857_v36  ;;  %v2855_v18 = vadd.f32 -1.0, %v3292_v4 }
 0x393   :  { %v2099_v41 = vpack.c.bf16 %v2092_v1, %v2091_v2  ;;  %v2090_v42 = vsel %vm2045_vm14, %v4528_v10, %v2856_v8 }
 0x394   :  { %2114 = vmatpush.bf16.msra.mxu1 %v2109_v34  ;;  %v2089_v49 = vsel %vm2044_vm15, %v4504_v57, %v2855_v18  ;;  %v3057_v57 = vld [vmem:[%s4622_s7 + $0x50] sm:$0xff] }
 0x395   :  { %v2098_v7 = vpack.c.bf16 %v2090_v42, %v2089_v49  ;;  %2324 = vmatpush.bf16.msrb.mxu3 %v3057_v57  ;;  %2270 = vmatpush.bf16.msrb.mxu2 %v3057_v57 }
 0x398   :  { %2115 = vmatpush.bf16.msra.mxu1 %v2100_v60 }
 0x39c   :  { %2116 = vmatpush.bf16.msra.mxu1 %v2099_v41 }
 0x3a0   :  { %2117 = vmatpush.bf16.msra.mxu1 %v2098_v7 }
 0x3a4   :  { %2118 = vmatpush.bf16.msra.mxu1 %v2097_v26  ;;  %v3056_v26 = vld [vmem:[%s4622_s7 + $0x48] sm:$0xff] }
 0x3a5   :  { %2325 = vmatpush.bf16.msrb.mxu3 %v3056_v26  ;;  %2271 = vmatpush.bf16.msrb.mxu2 %v3056_v26 }
 0x3a7   :  { %2862 = vmatmul.msk.bf16.vlgmr.msra.gmra.mxu1 %vm2102_vm1, %v2096_v43 }
 0x3a8   :  { %2217 = vmatpush.bf16.msrb.mxu1 %v3054_v53 }
 0x3a9   :  { %2326 = vmatpush.bf16.msrb.mxu3 %v3055_v52  ;;  %2272 = vmatpush.bf16.msrb.mxu2 %v3055_v52 }
 0x3ac   :  { %2218 = vmatpush.bf16.msrb.mxu1 %v3053_v28 }
 0x3b0   :  { %2219 = vmatpush.bf16.msrb.mxu1 %v3052_v16 }
 0x3b4   :  { %2220 = vmatpush.bf16.msrb.mxu1 %v3051_v47 }
 0x3b8   :  { %2287 = vmatpush.bf16.msra.mxu1 %v4536_v58 }
 0x3bc   :  { %2288 = vmatpush.bf16.msra.mxu1 %v4548_v12 }
 0x3c0   :  { %2289 = vmatpush.bf16.msra.mxu1 %v4555_v0 }
 0x3c4   :  { %2290 = vmatpush.bf16.msra.mxu1 %v3047_v61 }
 0x424   :  { %v2120_v55 = vpop.f32.mrf.mxu1 }
 0x425   :  { %v2125_v37 = vpack.c.bf16 %v2120_v55, %v2120_v55 }
 0x427   :  { %v2184_v39 = vshrl.u32 %v2125_v37, 16  ;;  %2879 = vmatmul.msk.bf16.vlgmr.msra.gmra.mxu2 %vm594_vm0, %v2125_v37  ;;  %v2237_v23 = vrot.slane %v2125_v37, 1  ;;  %v2297_v29 = vrot.slane %v2125_v37, 2 }
 0x428   :  { %2305 = vmatpush.bf16.msra.mxu2 %v3054_v53 }
 0x429   :  { %v2315_v50 = vrot.slane %v2184_v39, 2  ;;  %2904 = vmatmul.msk.bf16.vlgmr.msrb.gmra.mxu1 %vm594_vm0, %v2184_v39  ;;  %v2279_v63 = vrot.slane %v2184_v39, 1 }
 0x42b   :  { %2932 = vmatmul.msk.bf16.vlgmr.msrb.gmra.mxu3 %vm594_vm0, %v2315_v50 }
 0x42c   :  { %2306 = vmatpush.bf16.msra.mxu2 %v3053_v28  ;;  %v2122_v48 = vpop.f32.mrf.mxu1 }
 0x430   :  { %2307 = vmatpush.bf16.msra.mxu2 %v3052_v16 }
 0x434   :  { %2308 = vmatpush.bf16.msra.mxu2 %v3051_v47 }
 0x437   :  { %2929 = vmatmul.msk.bf16.vlgmr.msrb.gmra.mxu2 %vm594_vm0, %v2237_v23 }
 0x439   :  { %2930 = vmatmul.msk.bf16.vlgmr.msra.gmra.mxu1 %vm594_vm0, %v2279_v63 }
 0x447   :  { %2931 = vmatmul.msk.bf16.vlgmr.msra.gmra.mxu2 %vm594_vm0, %v2297_v29 }
 0x4a6   :  { %v2222_v10 = vpop.f32.mrf.mxu1 }
 0x4aa   :  { %v2170_v51 = vpop.f32.mrf.mxu2 }
 0x4ab   :  { %v2174_v58 = vadd.f32 %v2170_v51, %v2124_v31 }
 0x4ad   :  { %v2226_v12 = vadd.f32 %v2222_v10, %v2174_v58 }
 0x4ae   :  { %v2224_v54 = vpop.f32.mrf.mxu1  ;;  %v2328_v25 = vpop.f32.mrf.mxu3 }
 0x4b2   :  { %v2172_v40 = vpop.f32.mrf.mxu2 }
 0x4b6   :  { %v2292_v46 = vpop.f32.mrf.mxu1  ;;  %v2330_v56 = vpop.f32.mrf.mxu3 }
 0x4b7   :  { %v2296_v14 = vadd.f32 %v2292_v46, %v2124_v31 }
 0x4ba   :  { %v2274_v38 = vpop.f32.mrf.mxu2 }
 0x4bb   :  { %v2278_v21 = vadd.f32 %v2274_v38, %v2226_v12 }
 0x4be   :  { %v2294_v59 = vpop.f32.mrf.mxu1 }
 0x4c2   :  { %v2276_v13 = vpop.f32.mrf.mxu2 }
 0x4ca   :  { %v2310_v5 = vpop.f32.mrf.mxu2 }
 0x4cb   :  { %v2314_v11 = vadd.f32 %v2310_v5, %v2296_v14 }
 0x4cd   :  { %v2332_v19 = vadd.f32 %v2328_v25, %v2314_v11 }
 0x4cf   :  { %v2334_v24 = vperm.slane %v2332_v19, 0 }
 0x4d1   :  { %v2336_v27 = vsel %vm1132_vm3, %v2278_v21, %v2334_v24 }
 0x4d2   :  { %v2312_v30 = vpop.f32.mrf.mxu2  ;;  %2337 = vst [vmem:[#allocation9] sm:$0x3] %v2336_v27 }
 0x4d3   :  { %2348 = dma.vmem_to_hbm [thread:$0]  %s2344_s13, 32, %s2346_s15, [#allocation5]  }
 0x4d4   :  { %3393 = dma.done.wait [#allocation5], 32  }
 0x4d5   :  { %3394 = vsyncadd [#allocation5], 4294967264 }
 0x4d6   :  { %2353 = vsyncpa [#allocation4], 1 }
 0x4d7   :  { %2354 = vsyncpa [#allocation7], 1 }
 0x4d8   :  { %2355 = vsyncpa [#allocation5], 1 }

</bundles_post_ra>
